<compile_context>
chip_gen: v7x
topology: tpu7x:2x2x1
jax: 0.10.0
libtpu: 0.0.40
codegen_flags: <defaults>
</compile_context>

<pallas_src>
import math
import numpy as np
import jax
import jax.numpy as jnp
from jax.experimental import pallas as pl
from jax.experimental.pallas import tpu as pltpu

FEATURE_DIM = 32          # d_model
NUM_HEADS = 4
HEAD_DIM = FEATURE_DIM // NUM_HEADS
EPS = 1e-5                # InstanceNorm1d default eps
NEG_INF = -1e30


def _round_up(v, m):
    return ((v + m - 1) // m) * m


def _make_kernel(N, M, N_pad, M_pad, TN, TM):
    """Build the kernel body closed over the static shape parameters."""
    D, H, HD = FEATURE_DIM, NUM_HEADS, HEAD_DIM
    NT, MT = N_pad // TN, M_pad // TM
    inv_n = 1.0 / float(N)

    def kernel(x_ref, s_ref, w_ref, w2_ref, b_ref, out_ref,
               q_sc, m_sc, l_sc, acc_sc, h1_sc):
        n_idx = pl.program_id(1)
        m_idx = pl.program_id(2)
        n_off = pl.multiple_of(n_idx * TN, TN)

        # Packed weights / biases (constant index maps -> fetched once).
        w_qx = w_ref[0:3 * D, :]        # [wq*scale ; w1[:, :D]]           (3D, D) bf16
        w_kv = w_ref[3 * D:5 * D, :]    # [wk ; wv]  (head-major rows)     (2D, D) bf16
        w_1m = w_ref[5 * D:7 * D, :]    # w1[:, D:] @ wm  (fused merge)    (2D, D) bf16
        b_qx = b_ref[0:3 * D, :]        # [bq*scale ; b1_eff]              (3D, 1) f32
        b_kv = b_ref[3 * D:5 * D, :]    # [bk ; bv]                        (2D, 1) f32
        b_2 = b_ref[5 * D:6 * D, :]     # b2                               (D, 1)  f32

        # ---- per-N-tile init: one MXU push for q AND the w1x part of the MLP ----
        @pl.when(m_idx == 0)
        def _init():
            m_sc[...] = jnp.full_like(m_sc, -jnp.inf)
            l_sc[...] = jnp.zeros_like(l_sc)
            acc_sc[...] = jnp.zeros_like(acc_sc)
            qx = jnp.dot(w_qx, x_ref[...],
                         preferred_element_type=jnp.float32) + b_qx       # (3D, TN)
            q_sc[...] = qx[0:D, :]                     # head-major, 1/sqrt(hd) folded
            h1_sc[:, pl.ds(n_off, TN)] = qx[D:3 * D, :]    # w1x@x + b1_eff staged

        # ---- stream one M block: K/V projection + online softmax update ----
        kv = jnp.dot(w_kv, s_ref[...],
                     preferred_element_type=jnp.float32) + b_kv           # (2D, TM) f32
        kh = kv[0:D, :].reshape(H, HD, TM)
        vh = kv[D:2 * D, :].reshape(H, HD, TM)
        qh = q_sc[...].reshape(H, HD, TN)

        # s[h, m, n] = sum_d k[h,d,m] * q[h,d,n]   (transposed layout: stats on lanes)
        s = jax.lax.dot_general(
            kh, qh, dimension_numbers=(((1,), (1,)), ((0,), (0,))),
            preferred_element_type=jnp.float32)                           # (H, TM, TN)
        if M_pad != M:      # static: mask zero-padded source columns out of softmax
            row = jax.lax.broadcasted_iota(jnp.int32, (1, TM, 1), 1) + m_idx * TM
            s = jnp.where(row < M, s, NEG_INF)

        m_prev = m_sc[...]                                                # (H, 1, TN)
        m_new = jnp.maximum(m_prev, jnp.max(s, axis=1, keepdims=True))
        alpha = jnp.exp(m_prev - m_new)
        e = jnp.exp(s - m_new)                                            # (H, TM, TN)
        l_sc[...] = alpha * l_sc[...] + jnp.sum(e, axis=1, keepdims=True)
        pv = jax.lax.dot_general(
            vh, e, dimension_numbers=(((2,), (1,)), ((0,), (0,))),
            preferred_element_type=jnp.float32)                           # (H, HD, TN)
        acc_sc[...] = alpha * acc_sc[...] + pv
        m_sc[...] = m_new

        # ---- per-N-tile finalize: scale by 1/l, add fused merge+MLP contribution ----
        @pl.when(m_idx == MT - 1)
        def _tile_done():
            inv_l = pl.reciprocal(l_sc[...], approx=True)                 # (H, 1, TN)
            att = (acc_sc[...] * inv_l).reshape(D, TN)                    # head-major
            h1m = jnp.dot(w_1m, att.astype(jnp.bfloat16),
                          preferred_element_type=jnp.float32)             # (2D, TN)
            h1_sc[:, pl.ds(n_off, TN)] = h1_sc[:, pl.ds(n_off, TN)] + h1m

        # ---- global finalize: masked InstanceNorm over real N + ReLU + final conv ----
        @pl.when((n_idx == NT - 1) & (m_idx == MT - 1))
        def _finalize():
            h1 = h1_sc[...]                                               # (2D, N_pad)
            if N_pad != N:
                lane = jax.lax.broadcasted_iota(jnp.int32, (1, N_pad), 1)
                valid = lane < N
                mean = jnp.sum(jnp.where(valid, h1, 0.0), axis=-1,
                               keepdims=True) * inv_n
                d = h1 - mean
                var = jnp.sum(jnp.where(valid, d * d, 0.0), axis=-1,
                              keepdims=True) * inv_n
            else:
                mean = jnp.sum(h1, axis=-1, keepdims=True) * inv_n
                d = h1 - mean
                var = jnp.sum(d * d, axis=-1, keepdims=True) * inv_n
            h1n = jnp.maximum(d * jax.lax.rsqrt(var + EPS), 0.0)
            # TODO(synk): output could be emitted in bf16 (halves HBM writeback);
            # kept f32 here to preserve the module's f32 interface exactly.
            out_ref[...] = jnp.dot(w2_ref[...], h1n.astype(jnp.bfloat16),
                                   preferred_element_type=jnp.float32) + b_2

    return kernel


def attentional_propagation(x, source, params):
    """x: (B, D, N), source: (B, D, M) in PyTorch NCL layout -> (B, D, N) f32."""
    B, D, N = x.shape
    M = source.shape[2]
    assert D == FEATURE_DIM
    H, HD = NUM_HEADS, HEAD_DIM

    # Lane padding (lane-dense loads/stores) + v7x-friendly flash tile sizes.
    N_pad = _round_up(N, 128)
    M_pad = _round_up(M, 128)
    TN = 256 if N_pad % 256 == 0 else 128
    TM = 512 if M_pad % 512 == 0 else (256 if M_pad % 256 == 0 else 128)
    NT, MT = N_pad // TN, M_pad // TM

    # PyTorch view(B, HD, H, L) maps channel c_old = d*H + h.  Reorder projection
    # output channels to head-major c_new = h*HD + d so each head is a contiguous
    # 8-row sublane group; the fused merge weight gets the compensating column perm.
    c_new = np.arange(D)
    perm = (c_new % HD) * H + (c_new // HD)          # perm[c_new] = c_old
    scale = 1.0 / math.sqrt(HD)

    w1 = params["w1"].astype(jnp.float32)
    # Fold the merge conv into the MLP (exact: message only feeds the MLP).  f32.
    w1m_eff = w1[:, D:] @ params["wm"][:, perm].astype(jnp.float32)        # (2D, D)
    b1_eff = params["b1"] + w1[:, D:] @ params["bm"]                       # (2D,)

    w_stack = jnp.concatenate([
        params["wq"][perm, :] * scale,      # q rows (attention scale folded)
        w1[:, :D],                          # w1x rows
        params["wk"][perm, :],
        params["wv"][perm, :],
        w1m_eff,
    ], axis=0).astype(jnp.bfloat16)                                        # (7D, D)
    w2 = params["w2"].astype(jnp.bfloat16)                                 # (D, 2D)
    biases = jnp.concatenate([
        params["bq"][perm] * scale, b1_eff,
        params["bk"][perm], params["bv"][perm],
        params["b2"],
    ], axis=0).astype(jnp.float32)[:, None]                                # (6D, 1)

    x_p = x.astype(jnp.bfloat16)
    s_p = source.astype(jnp.bfloat16)
    if N_pad != N:
        x_p = jnp.pad(x_p, ((0, 0), (0, 0), (0, N_pad - N)))
    if M_pad != M:
        s_p = jnp.pad(s_p, ((0, 0), (0, 0), (0, M_pad - M)))

    kernel = _make_kernel(N, M, N_pad, M_pad, TN, TM)

    out = pl.pallas_call(
        kernel,
        out_shape=jax.ShapeDtypeStruct((B, D, N_pad), jnp.float32),
        grid=(B, NT, MT),
        in_specs=[
            pl.BlockSpec((None, D, TN), lambda b, n, m: (b, 0, n)),
            pl.BlockSpec((None, D, TM), lambda b, n, m: (b, 0, m)),
            pl.BlockSpec((7 * D, D), lambda b, n, m: (0, 0)),
            pl.BlockSpec((D, 2 * D), lambda b, n, m: (0, 0)),
            pl.BlockSpec((6 * D, 1), lambda b, n, m: (0, 0)),
        ],
        out_specs=pl.BlockSpec((None, D, N_pad), lambda b, n, m: (b, 0, 0)),
        scratch_shapes=[
            pltpu.VMEM((D, TN), jnp.float32),             # q (head-major, scaled)
            pltpu.VMEM((H, 1, TN), jnp.float32),          # running max
            pltpu.VMEM((H, 1, TN), jnp.float32),          # running denominator
            pltpu.VMEM((H, HD, TN), jnp.float32),         # att accumulator
            pltpu.VMEM((2 * D, N_pad), jnp.float32),      # staged pre-norm MLP acts
        ],
        compiler_params=pltpu.CompilerParams(
            dimension_semantics=("parallel", "arbitrary", "arbitrary")),
    )(x_p, s_p, w_stack, w2, biases)

    return out[:, :, :N] if N_pad != N else out


def reference_forward(x, source, params):
    """Pure-JAX f32 mirror of the PyTorch module (NCL layout throughout)."""
    B, D, N = x.shape
    M = source.shape[2]
    dim, H = HEAD_DIM, NUM_HEADS

    def conv1d(inp, w, b):
        return jnp.einsum("oc,bcn->bon", w, inp) + b[None, :, None]

    q = conv1d(x, params["wq"], params["bq"]).reshape(B, dim, H, N)
    k = conv1d(source, params["wk"], params["bk"]).reshape(B, dim, H, M)
    v = conv1d(source, params["wv"], params["bv"]).reshape(B, dim, H, M)
    scores = jnp.einsum("bdhn,bdhm->bhnm", q, k) / math.sqrt(dim)
    prob = jax.nn.softmax(scores, axis=-1)
    att = jnp.einsum("bhnm,bdhm->bdhn", prob, v).reshape(B, D, N)
    message = conv1d(att, params["wm"], params["bm"])

    cat = jnp.concatenate([x, message], axis=1)          # (B, 2D, N)
    h1 = conv1d(cat, params["w1"], params["b1"])
    mean = jnp.mean(h1, axis=2, keepdims=True)
    var = jnp.mean((h1 - mean) ** 2, axis=2, keepdims=True)
    h1 = (h1 - mean) / jnp.sqrt(var + EPS)
    h1 = jnp.maximum(h1, 0.0)
    return conv1d(h1, params["w2"], params["b2"])


if __name__ == "__main__":
    B, D, N, M = 2, FEATURE_DIM, 8, 8

    key = jax.random.PRNGKey(0)
    ks = jax.random.split(key, 14)

    def init(k, shape, s=0.1):
        return s * jax.random.normal(k, shape, dtype=jnp.float32)

    params = {
        "wq": init(ks[0], (D, D)),  "bq": init(ks[1], (D,)),
        "wk": init(ks[2], (D, D)),  "bk": init(ks[3], (D,)),
        "wv": init(ks[4], (D, D)),  "bv": init(ks[5], (D,)),
        "wm": init(ks[6], (D, D)),  "bm": init(ks[7], (D,)),
        "w1": init(ks[8], (2 * D, 2 * D)), "b1": init(ks[9], (2 * D,)),
        "w2": init(ks[10], (D, 2 * D)),
        "b2": jnp.zeros((D,), jnp.float32),   # nn.init.constant_(mlp[-1].bias, 0.0)
    }

    x = jax.random.normal(ks[11], (B, D, N), dtype=jnp.float32)
    source = jax.random.normal(ks[12], (B, D, M), dtype=jnp.float32)

    out = jax.block_until_ready(attentional_propagation(x, source, params))
    ref = jax.block_until_ready(reference_forward(x, source, params))

    assert out.shape == (B, D, N)
    assert np.allclose(np.asarray(out), np.asarray(ref), atol=5e-2, rtol=5e-2), (
        "Pallas kernel output does not match reference")

    print("KERNEL_OK")
</pallas_src>

<mosaic_0001>
module attributes {stable_mosaic.version = 11 : i64} {
  func.func @kernel(%arg0: i32, %arg1: i32, %arg2: i32, %arg3: memref<1x32x128xbf16, #tpu.memory_space<vmem>>, %arg4: memref<1x32x128xbf16, #tpu.memory_space<vmem>>, %arg5: memref<224x32xbf16, #tpu.memory_space<vmem>>, %arg6: memref<32x64xbf16, #tpu.memory_space<vmem>>, %arg7: memref<192x1xf32, #tpu.memory_space<vmem>>, %arg8: memref<1x32x128xf32, #tpu.memory_space<vmem>>, %arg9: memref<32x128xf32, #tpu.memory_space<vmem>>, %arg10: memref<4x1x128xf32, #tpu.memory_space<vmem>>, %arg11: memref<4x1x128xf32, #tpu.memory_space<vmem>>, %arg12: memref<4x8x128xf32, #tpu.memory_space<vmem>>, %arg13: memref<64x128xf32, #tpu.memory_space<vmem>>) attributes {dimension_semantics = [#tpu.dimension_semantics<parallel>, #tpu.dimension_semantics<arbitrary>, #tpu.dimension_semantics<arbitrary>], iteration_bounds = array<i64: 2, 1, 1>, scalar_prefetch = 0 : i64, scratch_operands = 5 : i64, tpu.core_type = #tpu.core_type<tc>, window_params = [{transform_indices = @transform_0, window_bounds = array<i64: 1, 32, 128>}, {transform_indices = @transform_1, window_bounds = array<i64: 1, 32, 128>}, {pipeline_mode = #tpu.pipeline_mode<synchronous>, transform_indices = @transform_2, window_bounds = array<i64: 224, 32>}, {pipeline_mode = #tpu.pipeline_mode<synchronous>, transform_indices = @transform_3, window_bounds = array<i64: 32, 64>}, {pipeline_mode = #tpu.pipeline_mode<synchronous>, transform_indices = @transform_4, window_bounds = array<i64: 192, 1>}, {transform_indices = @transform_5, window_bounds = array<i64: 1, 32, 128>}]} {
    %c128_i32 = arith.constant 128 : i32
    %0 = arith.muli %arg1, %c128_i32 : i32
    %1 = tpu.assume_multiple %0, 128 : i32
    %c0 = arith.constant 0 : index
    %c0_0 = arith.constant 0 : index
    %2 = vector.load %arg5[%c0, %c0_0] : memref<224x32xbf16, #tpu.memory_space<vmem>>, vector<96x32xbf16>
    %c96 = arith.constant 96 : index
    %c0_1 = arith.constant 0 : index
    %3 = vector.load %arg5[%c96, %c0_1] : memref<224x32xbf16, #tpu.memory_space<vmem>>, vector<64x32xbf16>
    %c160 = arith.constant 160 : index
    %c0_2 = arith.constant 0 : index
    %4 = vector.load %arg5[%c160, %c0_2] : memref<224x32xbf16, #tpu.memory_space<vmem>>, vector<64x32xbf16>
    %c0_3 = arith.constant 0 : index
    %c0_4 = arith.constant 0 : index
    %5 = vector.load %arg7[%c0_3, %c0_4] : memref<192x1xf32, #tpu.memory_space<vmem>>, vector<96x1xf32>
    %c96_5 = arith.constant 96 : index
    %c0_6 = arith.constant 0 : index
    %6 = vector.load %arg7[%c96_5, %c0_6] : memref<192x1xf32, #tpu.memory_space<vmem>>, vector<64x1xf32>
    %c160_7 = arith.constant 160 : index
    %c0_8 = arith.constant 0 : index
    %7 = vector.load %arg7[%c160_7, %c0_8] : memref<192x1xf32, #tpu.memory_space<vmem>>, vector<32x1xf32>
    %c0_i32 = arith.constant 0 : i32
    %8 = arith.cmpi eq, %arg2, %c0_i32 : i32
    %9 = arith.extui %8 : i1 to i32
    %c0_i32_9 = arith.constant 0 : i32
    %10 = arith.cmpi ne, %9, %c0_i32_9 : i32
    scf.if %10 {
      %cst_44 = arith.constant 0xFF800000 : f32
      %63 = vector.broadcast %cst_44 : f32 to vector<4x1x128xf32>
      %c0_45 = arith.constant 0 : index
      %c0_46 = arith.constant 0 : index
      %c0_47 = arith.constant 0 : index
      %64 = vector.load %arg10[%c0_45, %c0_46, %c0_47] : memref<4x1x128xf32, #tpu.memory_space<vmem>>, vector<4x1x128xf32>
      tpu.vector_store %arg10[%c0_45, %c0_46, %c0_47], %63 {strides = array<i32>} : memref<4x1x128xf32, #tpu.memory_space<vmem>>, vector<4x1x128xf32>,
      %cst_48 = arith.constant 0.000000e+00 : f32
      %65 = vector.broadcast %cst_48 : f32 to vector<4x1x128xf32>
      %c0_49 = arith.constant 0 : index
      %c0_50 = arith.constant 0 : index
      %c0_51 = arith.constant 0 : index
      %66 = vector.load %arg11[%c0_49, %c0_50, %c0_51] : memref<4x1x128xf32, #tpu.memory_space<vmem>>, vector<4x1x128xf32>
      tpu.vector_store %arg11[%c0_49, %c0_50, %c0_51], %65 {strides = array<i32>} : memref<4x1x128xf32, #tpu.memory_space<vmem>>, vector<4x1x128xf32>,
      %cst_52 = arith.constant 0.000000e+00 : f32
      %67 = vector.broadcast %cst_52 : f32 to vector<4x8x128xf32>
      %c0_53 = arith.constant 0 : index
      %c0_54 = arith.constant 0 : index
      %c0_55 = arith.constant 0 : index
      %68 = vector.load %arg12[%c0_53, %c0_54, %c0_55] : memref<4x8x128xf32, #tpu.memory_space<vmem>>, vector<4x8x128xf32>
      tpu.vector_store %arg12[%c0_53, %c0_54, %c0_55], %67 {strides = array<i32>} : memref<4x8x128xf32, #tpu.memory_space<vmem>>, vector<4x8x128xf32>,
      %c0_56 = arith.constant 0 : index
      %c0_57 = arith.constant 0 : index
      %c0_58 = arith.constant 0 : index
      %69 = vector.load %arg3[%c0_56, %c0_57, %c0_58] : memref<1x32x128xbf16, #tpu.memory_space<vmem>>, vector<1x32x128xbf16>
      %70 = vector.shape_cast %69 : vector<1x32x128xbf16> to vector<32x128xbf16>
      %cst_59 = arith.constant dense<0.000000e+00> : vector<96x128xf32>
      %71 = tpu.matmul %2, %70, %cst_59 {dimension_numbers = #tpu.dot_dimension_numbers<[1], [0], [0], [1], [0, 0, 1, 1], [], []>} : vector<96x32xbf16>, vector<32x128xbf16>, vector<96x128xf32> -> vector<96x128xf32>
      %72 = vector.broadcast %5 : vector<96x1xf32> to vector<96x128xf32>
      %73 = arith.addf %71, %72 : vector<96x128xf32>
      %74 = vector.extract_strided_slice %73 {offsets = [0, 0], sizes = [32, 128], strides = [1, 1]} : vector<96x128xf32> to vector<32x128xf32>
      %c0_60 = arith.constant 0 : index
      %c0_61 = arith.constant 0 : index
      %75 = vector.load %arg9[%c0_60, %c0_61] : memref<32x128xf32, #tpu.memory_space<vmem>>, vector<32x128xf32>
      tpu.vector_store %arg9[%c0_60, %c0_61], %74 {strides = array<i32>} : memref<32x128xf32, #tpu.memory_space<vmem>>, vector<32x128xf32>,
      %76 = vector.extract_strided_slice %73 {offsets = [32, 0], sizes = [64, 128], strides = [1, 1]} : vector<96x128xf32> to vector<64x128xf32>
      %c0_62 = arith.constant 0 : index
      %77 = arith.index_cast %1 : i32 to index
      %78 = vector.load %arg13[%c0_62, %77] : memref<64x128xf32, #tpu.memory_space<vmem>>, vector<64x128xf32>
      tpu.vector_store %arg13[%c0_62, %77], %76 {strides = array<i32>} : memref<64x128xf32, #tpu.memory_space<vmem>>, vector<64x128xf32>,
    } else {
    }
    %c0_10 = arith.constant 0 : index
    %c0_11 = arith.constant 0 : index
    %c0_12 = arith.constant 0 : index
    %11 = vector.load %arg4[%c0_10, %c0_11, %c0_12] : memref<1x32x128xbf16, #tpu.memory_space<vmem>>, vector<1x32x128xbf16>
    %12 = vector.shape_cast %11 : vector<1x32x128xbf16> to vector<32x128xbf16>
    %cst = arith.constant dense<0.000000e+00> : vector<64x128xf32>
    %13 = tpu.matmul %3, %12, %cst {dimension_numbers = #tpu.dot_dimension_numbers<[1], [0], [0], [1], [0, 0, 1, 1], [], []>} : vector<64x32xbf16>, vector<32x128xbf16>, vector<64x128xf32> -> vector<64x128xf32>
    %14 = vector.broadcast %6 : vector<64x1xf32> to vector<64x128xf32>
    %15 = arith.addf %13, %14 : vector<64x128xf32>
    %16 = vector.extract_strided_slice %15 {offsets = [0, 0], sizes = [32, 128], strides = [1, 1]} : vector<64x128xf32> to vector<32x128xf32>
    %17 = vector.shape_cast %16 : vector<32x128xf32> to vector<4x8x128xf32>
    %18 = vector.extract_strided_slice %15 {offsets = [32, 0], sizes = [32, 128], strides = [1, 1]} : vector<64x128xf32> to vector<32x128xf32>
    %19 = vector.shape_cast %18 : vector<32x128xf32> to vector<4x8x128xf32>
    %c0_13 = arith.constant 0 : index
    %c0_14 = arith.constant 0 : index
    %20 = vector.load %arg9[%c0_13, %c0_14] : memref<32x128xf32, #tpu.memory_space<vmem>>, vector<32x128xf32>
    %21 = vector.shape_cast %20 : vector<32x128xf32> to vector<4x8x128xf32>
    %cst_15 = arith.constant dense<0.000000e+00> : vector<4x128x128xf32>
    %22 = tpu.matmul %17, %21, %cst_15 {dimension_numbers = #tpu.dot_dimension_numbers<[1], [1], [2], [2], [0, 0, 0, 2, 1, 2], [0], [0]>} : vector<4x8x128xf32>, vector<4x8x128xf32>, vector<4x128x128xf32> -> vector<4x128x128xf32>
    %23 = tpu.iota {dimensions = array<i32: 1>} : vector<1x128x1xi32>
    %c128_i32_16 = arith.constant 128 : i32
    %24 = arith.muli %arg2, %c128_i32_16 : i32
    %25 = vector.broadcast %24 : i32 to vector<1x128x1xi32>
    %26 = arith.addi %23, %25 : vector<1x128x1xi32>
    %c8_i32 = arith.constant 8 : i32
    %27 = vector.broadcast %c8_i32 : i32 to vector<1x128x1xi32>
    %28 = arith.cmpi slt, %26, %27 : vector<1x128x1xi32>
    %cst_17 = arith.constant -1.000000e+30 : f32
    %29 = vector.shape_cast %28 : vector<1x128x1xi1> to vector<1x128x1xi1>
    %30 = vector.broadcast %29 : vector<1x128x1xi1> to vector<4x128x128xi1>
    %31 = vector.broadcast %cst_17 : f32 to vector<4x128x128xf32>
    %32 = arith.select %30, %22, %31 : vector<4x128x128xi1>, vector<4x128x128xf32>
    %c0_18 = arith.constant 0 : index
    %c0_19 = arith.constant 0 : index
    %c0_20 = arith.constant 0 : index
    %33 = vector.load %arg10[%c0_18, %c0_19, %c0_20] : memref<4x1x128xf32, #tpu.memory_space<vmem>>, vector<4x1x128xf32>
    %cst_21 = arith.constant dense<0xFF800000> : vector<4x128xf32>
    %34 = vector.multi_reduction <maximumf>, %32, %cst_21 [1] : vector<4x128x128xf32> to vector<4x128xf32>
    %35 = vector.shape_cast %34 : vector<4x128xf32> to vector<4x1x128xf32>
    %36 = arith.maximumf %33, %35 : vector<4x1x128xf32>
    %37 = arith.subf %33, %36 : vector<4x1x128xf32>
    %38 = math.exp %37 : vector<4x1x128xf32>
    %39 = vector.broadcast %36 : vector<4x1x128xf32> to vector<4x128x128xf32>
    %40 = arith.subf %32, %39 : vector<4x128x128xf32>
    %41 = math.exp %40 : vector<4x128x128xf32>
    %c0_22 = arith.constant 0 : index
    %c0_23 = arith.constant 0 : index
    %c0_24 = arith.constant 0 : index
    %42 = vector.load %arg11[%c0_22, %c0_23, %c0_24] : memref<4x1x128xf32, #tpu.memory_space<vmem>>, vector<4x1x128xf32>
    %43 = arith.mulf %38, %42 : vector<4x1x128xf32>
    %cst_25 = arith.constant dense<0.000000e+00> : vector<4x128xf32>
    %44 = vector.multi_reduction <add>, %41, %cst_25 [1] : vector<4x128x128xf32> to vector<4x128xf32>
    %45 = vector.shape_cast %44 : vector<4x128xf32> to vector<4x1x128xf32>
    %46 = arith.addf %43, %45 : vector<4x1x128xf32>
    %c0_26 = arith.constant 0 : index
    %c0_27 = arith.constant 0 : index
    %c0_28 = arith.constant 0 : index
    %47 = vector.load %arg11[%c0_26, %c0_27, %c0_28] : memref<4x1x128xf32, #tpu.memory_space<vmem>>, vector<4x1x128xf32>
    tpu.vector_store %arg11[%c0_26, %c0_27, %c0_28], %46 {strides = array<i32>} : memref<4x1x128xf32, #tpu.memory_space<vmem>>, vector<4x1x128xf32>,
    %cst_29 = arith.constant dense<0.000000e+00> : vector<4x8x128xf32>
    %48 = tpu.matmul %19, %41, %cst_29 {dimension_numbers = #tpu.dot_dimension_numbers<[2], [1], [1], [2], [0, 0, 0, 1, 1, 2], [0], [0]>} : vector<4x8x128xf32>, vector<4x128x128xf32>, vector<4x8x128xf32> -> vector<4x8x128xf32>
    %c0_30 = arith.constant 0 : index
    %c0_31 = arith.constant 0 : index
    %c0_32 = arith.constant 0 : index
    %49 = vector.load %arg12[%c0_30, %c0_31, %c0_32] : memref<4x8x128xf32, #tpu.memory_space<vmem>>, vector<4x8x128xf32>
    %50 = vector.broadcast %38 : vector<4x1x128xf32> to vector<4x8x128xf32>
    %51 = arith.mulf %50, %49 : vector<4x8x128xf32>
    %52 = arith.addf %51, %48 : vector<4x8x128xf32>
    %c0_33 = arith.constant 0 : index
    %c0_34 = arith.constant 0 : index
    %c0_35 = arith.constant 0 : index
    %53 = vector.load %arg12[%c0_33, %c0_34, %c0_35] : memref<4x8x128xf32, #tpu.memory_space<vmem>>, vector<4x8x128xf32>
    tpu.vector_store %arg12[%c0_33, %c0_34, %c0_35], %52 {strides = array<i32>} : memref<4x8x128xf32, #tpu.memory_space<vmem>>, vector<4x8x128xf32>,
    %c0_36 = arith.constant 0 : index
    %c0_37 = arith.constant 0 : index
    %c0_38 = arith.constant 0 : index
    %54 = vector.load %arg10[%c0_36, %c0_37, %c0_38] : memref<4x1x128xf32, #tpu.memory_space<vmem>>, vector<4x1x128xf32>
    tpu.vector_store %arg10[%c0_36, %c0_37, %c0_38], %36 {strides = array<i32>} : memref<4x1x128xf32, #tpu.memory_space<vmem>>, vector<4x1x128xf32>,
    %c0_i32_39 = arith.constant 0 : i32
    %55 = arith.cmpi eq, %arg2, %c0_i32_39 : i32
    %56 = arith.extui %55 : i1 to i32
    %c0_i32_40 = arith.constant 0 : i32
    %57 = arith.cmpi ne, %56, %c0_i32_40 : i32
    scf.if %57 {
      %c0_44 = arith.constant 0 : index
      %c0_45 = arith.constant 0 : index
      %c0_46 = arith.constant 0 : index
      %63 = vector.load %arg11[%c0_44, %c0_45, %c0_46] : memref<4x1x128xf32, #tpu.memory_space<vmem>>, vector<4x1x128xf32>
      %64 = tpu.reciprocal %63 {approx = true} : vector<4x1x128xf32> -> vector<4x1x128xf32>
      %c0_47 = arith.constant 0 : index
      %c0_48 = arith.constant 0 : index
      %c0_49 = arith.constant 0 : index
      %65 = vector.load %arg12[%c0_47, %c0_48, %c0_49] : memref<4x8x128xf32, #tpu.memory_space<vmem>>, vector<4x8x128xf32>
      %66 = vector.broadcast %64 : vector<4x1x128xf32> to vector<4x8x128xf32>
      %67 = arith.mulf %65, %66 : vector<4x8x128xf32>
      %68 = vector.shape_cast %67 : vector<4x8x128xf32> to vector<32x128xf32>
      %69 = arith.truncf %68 : vector<32x128xf32> to vector<32x128xbf16>
      %cst_50 = arith.constant dense<0.000000e+00> : vector<64x128xf32>
      %70 = tpu.matmul %4, %69, %cst_50 {dimension_numbers = #tpu.dot_dimension_numbers<[1], [0], [0], [1], [0, 0, 1, 1], [], []>} : vector<64x32xbf16>, vector<32x128xbf16>, vector<64x128xf32> -> vector<64x128xf32>
      %c0_51 = arith.constant 0 : index
      %71 = arith.index_cast %1 : i32 to index
      %72 = vector.load %arg13[%c0_51, %71] : memref<64x128xf32, #tpu.memory_space<vmem>>, vector<64x128xf32>
      %73 = arith.addf %72, %70 : vector<64x128xf32>
      %c0_52 = arith.constant 0 : index
      %74 = arith.index_cast %1 : i32 to index
      %75 = vector.load %arg13[%c0_52, %74] : memref<64x128xf32, #tpu.memory_space<vmem>>, vector<64x128xf32>
      tpu.vector_store %arg13[%c0_52, %74], %73 {strides = array<i32>} : memref<64x128xf32, #tpu.memory_space<vmem>>, vector<64x128xf32>,
    } else {
    }
    %c0_i32_41 = arith.constant 0 : i32
    %58 = arith.cmpi eq, %arg1, %c0_i32_41 : i32
    %c0_i32_42 = arith.constant 0 : i32
    %59 = arith.cmpi eq, %arg2, %c0_i32_42 : i32
    %60 = arith.andi %58, %59 : i1
    %61 = arith.extui %60 : i1 to i32
    %c0_i32_43 = arith.constant 0 : i32
    %62 = arith.cmpi ne, %61, %c0_i32_43 : i32
    scf.if %62 {
      %c0_44 = arith.constant 0 : index
      %c0_45 = arith.constant 0 : index
      %63 = vector.load %arg13[%c0_44, %c0_45] : memref<64x128xf32, #tpu.memory_space<vmem>>, vector<64x128xf32>
      %64 = tpu.iota {dimensions = array<i32: 1>} : vector<1x128xi32>
      %c8_i32_46 = arith.constant 8 : i32
      %65 = vector.broadcast %c8_i32_46 : i32 to vector<1x128xi32>
      %66 = arith.cmpi slt, %64, %65 : vector<1x128xi32>
      %cst_47 = arith.constant 0.000000e+00 : f32
      %67 = vector.shape_cast %66 : vector<1x128xi1> to vector<1x128xi1>
      %68 = vector.broadcast %67 : vector<1x128xi1> to vector<64x128xi1>
      %69 = vector.broadcast %cst_47 : f32 to vector<64x128xf32>
      %70 = arith.select %68, %63, %69 : vector<64x128xi1>, vector<64x128xf32>
      %cst_48 = arith.constant dense<0.000000e+00> : vector<64xf32>
      %71 = vector.multi_reduction <add>, %70, %cst_48 [1] : vector<64x128xf32> to vector<64xf32>
      %72 = vector.shape_cast %71 : vector<64xf32> to vector<64x1xf32>
      %cst_49 = arith.constant 1.250000e-01 : f32
      %73 = vector.broadcast %cst_49 : f32 to vector<64x1xf32>
      %74 = arith.mulf %72, %73 : vector<64x1xf32>
      %75 = vector.broadcast %74 : vector<64x1xf32> to vector<64x128xf32>
      %76 = arith.subf %63, %75 : vector<64x128xf32>
      %77 = arith.mulf %76, %76 : vector<64x128xf32>
      %cst_50 = arith.constant 0.000000e+00 : f32
      %78 = vector.shape_cast %66 : vector<1x128xi1> to vector<1x128xi1>
      %79 = vector.broadcast %78 : vector<1x128xi1> to vector<64x128xi1>
      %80 = vector.broadcast %cst_50 : f32 to vector<64x128xf32>
      %81 = arith.select %79, %77, %80 : vector<64x128xi1>, vector<64x128xf32>
      %cst_51 = arith.constant dense<0.000000e+00> : vector<64xf32>
      %82 = vector.multi_reduction <add>, %81, %cst_51 [1] : vector<64x128xf32> to vector<64xf32>
      %83 = vector.shape_cast %82 : vector<64xf32> to vector<64x1xf32>
      %cst_52 = arith.constant 1.250000e-01 : f32
      %84 = vector.broadcast %cst_52 : f32 to vector<64x1xf32>
      %85 = arith.mulf %83, %84 : vector<64x1xf32>
      %cst_53 = arith.constant 9.99999974E-6 : f32
      %86 = vector.broadcast %cst_53 : f32 to vector<64x1xf32>
      %87 = arith.addf %85, %86 : vector<64x1xf32>
      %88 = math.rsqrt %87 : vector<64x1xf32>
      %89 = vector.broadcast %88 : vector<64x1xf32> to vector<64x128xf32>
      %90 = arith.mulf %76, %89 : vector<64x128xf32>
      %cst_54 = arith.constant 0.000000e+00 : f32
      %91 = vector.broadcast %cst_54 : f32 to vector<64x128xf32>
      %92 = arith.maximumf %90, %91 : vector<64x128xf32>
      %c0_55 = arith.constant 0 : index
      %c0_56 = arith.constant 0 : index
      %93 = vector.load %arg6[%c0_55, %c0_56] : memref<32x64xbf16, #tpu.memory_space<vmem>>, vector<32x64xbf16>
      %94 = arith.truncf %92 : vector<64x128xf32> to vector<64x128xbf16>
      %cst_57 = arith.constant dense<0.000000e+00> : vector<32x128xf32>
      %95 = tpu.matmul %93, %94, %cst_57 {dimension_numbers = #tpu.dot_dimension_numbers<[1], [0], [0], [1], [0, 0, 1, 1], [], []>} : vector<32x64xbf16>, vector<64x128xbf16>, vector<32x128xf32> -> vector<32x128xf32>
      %96 = vector.broadcast %7 : vector<32x1xf32> to vector<32x128xf32>
      %97 = arith.addf %95, %96 : vector<32x128xf32>
      %c0_58 = arith.constant 0 : index
      %c0_59 = arith.constant 0 : index
      %c0_60 = arith.constant 0 : index
      %98 = vector.load %arg8[%c0_58, %c0_59, %c0_60] : memref<1x32x128xf32, #tpu.memory_space<vmem>>, vector<1x32x128xf32>
      %99 = vector.shape_cast %98 : vector<1x32x128xf32> to vector<32x128xf32>
      %100 = vector.shape_cast %97 : vector<32x128xf32> to vector<1x32x128xf32>
      tpu.vector_store %arg8[%c0_58, %c0_59, %c0_60], %100 {strides = array<i32>} : memref<1x32x128xf32, #tpu.memory_space<vmem>>, vector<1x32x128xf32>,
    } else {
    }
    return
  }
  func.func @transform_0(%arg0: i32, %arg1: i32, %arg2: i32) -> (i32, i32, i32) {
    %c0_i32 = arith.constant 0 : i32
    %c0_i32_0 = arith.constant 0 : i32
    return %arg0, %c0_i32, %arg1 : i32, i32, i32
  }
  func.func @transform_1(%arg0: i32, %arg1: i32, %arg2: i32) -> (i32, i32, i32) {
    %c0_i32 = arith.constant 0 : i32
    %c0_i32_0 = arith.constant 0 : i32
    return %arg0, %c0_i32, %arg2 : i32, i32, i32
  }
  func.func @transform_2(%arg0: i32, %arg1: i32, %arg2: i32) -> (i32, i32) {
    %c0_i32 = arith.constant 0 : i32
    %c0_i32_0 = arith.constant 0 : i32
    %c0_i32_1 = arith.constant 0 : i32
    return %c0_i32, %c0_i32_0 : i32, i32
  }
  func.func @transform_3(%arg0: i32, %arg1: i32, %arg2: i32) -> (i32, i32) {
    %c0_i32 = arith.constant 0 : i32
    %c0_i32_0 = arith.constant 0 : i32
    %c0_i32_1 = arith.constant 0 : i32
    return %c0_i32, %c0_i32_0 : i32, i32
  }
  func.func @transform_4(%arg0: i32, %arg1: i32, %arg2: i32) -> (i32, i32) {
    %c0_i32 = arith.constant 0 : i32
    %c0_i32_0 = arith.constant 0 : i32
    %c0_i32_1 = arith.constant 0 : i32
    return %c0_i32, %c0_i32_0 : i32, i32
  }
  func.func @transform_5(%arg0: i32, %arg1: i32, %arg2: i32) -> (i32, i32, i32) {
    %c0_i32 = arith.constant 0 : i32
    %c0_i32_0 = arith.constant 0 : i32
    %c0_i32_1 = arith.constant 0 : i32
    return %arg0, %c0_i32, %c0_i32_0 : i32, i32, i32
  }
}

</mosaic_0001>

<bundles_post_ra>
// kernel: tpu_custom_call.1
= control target key start
LH: loop header
LB: loop body
LE: loop exit
PB: predicated region body
PF: predicated region fallthrough
CT: control target
= control target key end

     0   :  { %10 = vsyncpa [#allocation8], 0  ;;  %s4602_s0 = inlined_call_operand.vmem [shape: bf16[2,32,128], index: 0, kind: input, shape index: {}]   ;;  %s4603_s1 = inlined_call_operand.vmem [shape: bf16[2,32,128], index: 1, kind: input, shape index: {}]   ;;  %s4604_s2 = inlined_call_operand.vmem [shape: bf16[224,32], index: 2, kind: input, shape index: {}]   ;;  %s4605_s3 = inlined_call_operand.vmem [shape: bf16[32,64], index: 3, kind: input, shape index: {}]   ;;  %s4606_s4 = inlined_call_operand.vmem [shape: f32[192,1], index: 4, kind: input, shape index: {}]   ;;  %s4607_s5 = inlined_call_operand.hbm [shape: f32[2,32,128], index: 5, kind: output, shape index: {}]  }
   0x1   :  { %12 = vsyncpa [#allocation8 + $0x1], 0  ;;  %s3975_s18 = smov 0   ;;  %s3977_s19 = smov 0  }
   0x2   :  { %s3979_s20 = smov 0   ;;  %s3981_s21 = smov 0  }
   0x3   :  { %s3983_s22 = smov 0   ;;  %s3985_s23 = smov 0  }
   0x4 LB: > { %s3035_s24 = sadd.s32 4294967295, %s3935_s23   ;;  %s3036_s25 = sadd.s32 4294967294, %s3935_s23   ;;  %s3935_s23 = sphi %s3985_s23, %s18_s23   ;;  %s3931_s22 = sphi %s3983_s22, %s4614_s22   ;;  %s3927_s21 = sphi %s3981_s21, %s4613_s21   ;;  %s3923_s20 = sphi %s3979_s20, %s4612_s20   ;;  %s3919_s19 = sphi %s3977_s19, %s4611_s19   ;;  %s3915_s18 = sphi %s3975_s18, %s4610_s18  }
   0x5   : > { %s37_s26 = sadd.s32 1, %s3931_s22  ;;  %s163_s27 = sadd.s32 1, %s3923_s20 }
   0x6   : > { %p39_p0 = scmp.ge.s32.totalorder %s37_s26, 2  ;;  %p173_p1 = scmp.ne.s32.totalorder %s3923_s20, %s3919_s19 }
   0x7   : > { %p174_p2 = scmp.eq.s32.totalorder %s3035_s24, 1  ;;  %p179_p3 = scmp.ne.s32.totalorder %s3919_s19, %s3915_s18 }
   0x8   : > { %s4616_s26 = smov (%p39_p0, %s37_s26), 0  ;;  %p180_p5 = scmp.eq.s32.totalorder %s3036_s25, 1 }
   0x9   : > { %p4015_p4 = por %p174_p2, %p173_p1  ;;  %s160_s29 = ssub.s32 %s3931_s22, %s4616_s26 }
   0xa   : > { %p3039_p6 = scmp.ge.s32.totalorder %s3935_s23, 1  ;;  %p161_p7 = scmp.eq.s32.totalorder %s160_s29, 0 }
   0xb   : > { %p4022_p8 = por %p180_p5, %p179_p3  ;;  %p229_p9 = scmp.lt.s32.totalorder %s3935_s23, 3 }
   0xc   : > { %s4028_s6 = scalar_select %p161_p7, %s3923_s20, %s163_s27  }
   0xd   : > { %p230_p10 = pnand %p3039_p6, %p229_p9 }
   0xe   : > { %p268_p11 = scmp.lt.s32.totalorder (!%p230_p10), %s3927_s21, 1  ;;  %vm460_vm0 = vcmask (!%p230_p10), 261120   ;;  %v3791_v0 = vld [vmem:[%s4604_s2 + $0x30] sm:$0xff] (!%p230_p10)   ;;  %v3937_v1 = vmov (!%p230_p10), 0   ;;  %v3795_v2 = vld [vmem:[%s4604_s2] sm:$0xff] (!%p230_p10)   ;;  %v327_v4 = vld [vmem:[%s4606_s4 + $0x68] sm:$0xff] (!%p230_p10) }
   0xf   : > { %233 = sbr.rel (%p230_p10) target bundleno = 1760 (0x6e0), region = 40  ;;  %3787 = vset.pattern.permute.xlu0 (!%p230_p10), %v3937_v1  ;;  %3788 = vset.pattern.permute.xlu1 (!%p230_p10), %v3937_v1  ;;  %v326_v3 = vld [vmem:[%s4606_s4 + $0x60] sm:$0xff] (!%p230_p10)  ;;  %v328_v7 = vld [vmem:[%s4606_s4 + $0x70] sm:$0xff] (!%p230_p10)  ;;  %v3792_v11 = vld [vmem:[%s4604_s2 + $0x38] sm:$0xff] (!%p230_p10)   ;;  %vm765_vm1 = vcmask (!%p230_p10), 64512   ;;  %vm3941_vm2 = vmmov (!%p230_p10), 0  }
  0x10   : > { %3335 = vmatprep.mubr.msk.bf16.mxu1 (!%p230_p10), %vm460_vm0, %v3791_v0  ;;  %3319 = vmatprep.mubr.msk.bf16.mxu0 (!%p230_p10), %vm460_vm0, %v3795_v2  ;;  %v314_v5 = vld [vmem:[%s4606_s4] sm:$0xff] (!%p230_p10)  ;;  %v329_v12 = vld [vmem:[%s4606_s4 + $0x78] sm:$0xff] (!%p230_p10)  ;;  %v315_v13 = vld [vmem:[%s4606_s4 + $0x8] sm:$0xff] (!%p230_p10)  ;;  %vm2862_vm4 = vcmask (!%p230_p10), 523264   ;;  %s3942_s14 = smov (!%p230_p10), [#allocation7]  }
  0x11   : > { %581 = vperm.xlu0 (!%p230_p10), %3787, %v326_v3   ;;  %360 = vperm.xlu1 (!%p230_p10), %3788, %v314_v5   ;;  %v3796_v14 = vld [vmem:[%s4604_s2 + $0x8] sm:$0xff] (!%p230_p10)   ;;  %v316_v15 = vld [vmem:[%s4606_s4 + $0x10] sm:$0xff] (!%p230_p10)  ;;  %v317_v16 = vld [vmem:[%s4606_s4 + $0x18] sm:$0xff] (!%p230_p10)  ;;  %s3861_s15 = sshll.u32 (!%p230_p10), %s3942_s14, 4  ;;  %s3862_s15 = int_to_ptr.vmem [resolvable:$false] %s3861_s15 }
  0x12   : > { %v3797_v17 = vld [vmem:[%s4604_s2 + $0x40] sm:$0xff] (!%p230_p10)   ;;  %v3798_v18 = vld [vmem:[%s4604_s2 + $0x48] sm:$0xff] (!%p230_p10)   ;;  %v3799_v19 = vld [vmem:[%s4604_s2 + $0x10] sm:$0xff] (!%p230_p10)   ;;  %s3863_s16 = scalar_lea.vmem (!%p230_p10), %s3862_s15, 1024 }
  0x13   : > { %v3800_v20 = vld [vmem:[%s4604_s2 + $0x18] sm:$0xff] (!%p230_p10)   ;;  %v3801_v21 = vld [vmem:[%s4604_s2 + $0x20] sm:$0xff] (!%p230_p10)   ;;  %v3802_v22 = vld [vmem:[%s4604_s2 + $0x28] sm:$0xff] (!%p230_p10)  }
  0x14   : > { %v331_v60 = vld [vmem:[%s4606_s4 + $0x88] sm:$0xff] (!%p230_p10)  ;;  %v321_v5 = vld [vmem:[%s4606_s4 + $0x38] sm:$0xff] (!%p230_p10) }
  0x15   : > { %586 = vperm.xlu0 (!%p230_p10), %3787, %v327_v4   ;;  %591 = vperm.xlu1 (!%p230_p10), %3788, %v328_v7   ;;  %v319_v2 = vld [vmem:[%s4606_s4 + $0x28] sm:$0xff] (!%p230_p10) }
  0x16   : > { %s269_s9 = scalar_select %p268_p11, %s3927_s21, 1 }
  0x18   : > { %s3150_s12 = sshll.u32 %s269_s9, 4  ;;  %s3152_s9 = sshll.u32 %s3927_s21, 9 }
  0x19   : > { %s283_s17 = scalar_lea.vmem %s4603_s1, %s3150_s12  ;;  %s275_s27 = scalar_lea.vmem %s4602_s0, %s3150_s12  ;;  %596 = vperm.xlu0 %3787, %v329_v12   ;;  %365 = vperm.xlu1 %3788, %v315_v13   ;;  %v325_v13 = vld [vmem:[%s4606_s4 + $0x58] sm:$0xff] }
  0x1a   : > { %v3789_v6 = vld [vmem:[%s283_s17] sm:$0xff]   ;;  %v3790_v8 = vld [vmem:[%s283_s17 + $0x8] sm:$0xff]   ;;  %s4554_s12 = scalar_lea.hbm %s4607_s5, %s3152_s9 }
  0x1b   : > { %3331 = vmatprep.subr.bf16.mxu1 %v3789_v6  ;;  %v3793_v9 = vld [vmem:[%s275_s27] sm:$0xff]   ;;  %v3794_v10 = vld [vmem:[%s275_s27 + $0x8] sm:$0xff]   ;;  %s265_s27 = sand.u32 1, %s3919_s19  }
  0x1c   : > { %3332 = vmatpush3.bf16.msra.mxu1 %v3789_v6  ;;  %3315 = vmatprep.subr.bf16.mxu0 %v3793_v9  ;;  %v330_v6 = vld [vmem:[%s4606_s4 + $0x80] sm:$0xff]  ;;  %s3040_s29 = sshll.u32 %s265_s27, 5  ;;  %s4556_s21 = scalar_lea.sflag [#allocation8], %s265_s27 }
  0x1d   : > { %3333 = vmatprep.subr.bf16.mxu1 %v3790_v8  ;;  %3316 = vmatpush3.bf16.msra.mxu0 %v3793_v9  ;;  %v323_v9 = vld [vmem:[%s4606_s4 + $0x48] sm:$0xff]  ;;  %s267_s7 = scalar_lea.vmem [#allocation7], %s3040_s29 }
  0x1e   : > { %3317 = vmatprep.subr.bf16.mxu0 %v3794_v10  ;;  %370 = vperm.xlu1 %3788, %v316_v15   ;;  %s2936_s8 = sshll.u32 %s267_s7, 4  ;;  %s4549_s8 = int_to_ptr.vmem [resolvable:$true] %s2936_s8 }
  0x1f   : > { %s3857_s13 = scalar_lea.vmem %s4549_s8, 512  ;;  %p3864_p1 = scmp.lt.s32.totalorder %s4549_s8, %s3862_s15 }
  0x20   : > { %3334 = vmatpush3.bf16.msra.mxu1 %v3790_v8  ;;  %p3858_p12 = scmp.ne.s32.totalorder %s4549_s8, %s3857_s13  ;;  %p3865_p2 = scmp.lt.s32.totalorder %s3863_s16, %s3857_s13 }
  0x21   : > { %3318 = vmatpush3.bf16.msra.mxu0 %v3794_v10  ;;  %v332_v10 = vld [vmem:[%s4606_s4 + $0x90] sm:$0xff] }
  0x22   : > { %375 = vperm.xlu1 %3788, %v317_v16   ;;  %p3859_p13 = pnand %p3858_p12, %p4015_p4  ;;  %p3866_p3 = por %p3865_p2, %p3864_p1 }
  0x23   : > { %3336 = vmatmul.mubr.msk.bf16.vlgmr.msra.gmra.mrb[0].mxu1 %vm460_vm0, %v3792_v11 }
  0x24   : > { %3320 = vmatmul.mubr.msk.bf16.vlgmr.msra.gmra.mrb[0].mxu0 %vm460_vm0, %v3796_v14  ;;  %3339 = vmatprep.mubr.msk.bf16.mxu1 %vm460_vm0, %v3797_v17  ;;  %v333_v14 = vld [vmem:[%s4606_s4 + $0x98] sm:$0xff]  ;;  %v318_v17 = vld [vmem:[%s4606_s4 + $0x20] sm:$0xff]  ;;  %p3860_p0 = pneg %p3859_p13 }
  0x25   : > { %3323 = vmatprep.mubr.msk.bf16.mxu0 %vm460_vm0, %v3799_v19 }
  0x26   : > { %p3867_p5 = pnand %p3866_p3, %p3860_p0 }
  0x2b   : > { %3340 = vmatmul.mubr.msk.bf16.gmra.mrb[4].mxu1 %vm460_vm0, %v3798_v18 }
  0x2c   : > { %3324 = vmatmul.mubr.msk.bf16.gmra.mrb[4].mxu0 %vm460_vm0, %v3800_v20  ;;  %v320_v20 = vld [vmem:[%s4606_s4 + $0x30] sm:$0xff] }
  0x2d   : > { %3327 = vmatprep.mubr.msk.bf16.mxu0 %vm460_vm0, %v3801_v21 }
  0x34   : > { %3328 = vmatmul.mubr.msk.bf16.gmra.mrb[8].mxu0 %vm460_vm0, %v3802_v22 }
  0x90   : > { %v361_v23 = vpop.permute.xlu1 %360  ;;  %v582_v26 = vpop.permute.xlu0 %581 }
  0x94   : > { %v592_v24 = vpop.permute.xlu1 %591  ;;  %v587_v28 = vpop.permute.xlu0 %586 }
  0x98   : > { %v366_v25 = vpop.permute.xlu1 %365  ;;  %v597_v44 = vpop.permute.xlu0 %596 }
  0x9d   : > { %v371_v27 = vpop.permute.xlu1 %370 }
  0xa1   : > { %v376_v31 = vpop.permute.xlu1 %375 }
  0xf6   : > { %v3337_v29 = vpop.f32.mrb[0].mxu1 }
  0xf7   : > { %v698_v30 = vpop.f32.mrb[1].mxu1  ;;  %v3321_v34 = vpop.f32.mrb[0].mxu0  ;;  %v707_v43 = vadd.f32 %v3337_v29, %v592_v24 }
  0xf8   : > { %v699_v32 = vadd.f32 %v698_v30, %v582_v26  ;;  %v3338_v33 = vpop.f32.mrb[2].mxu1  ;;  %v513_v36 = vpop.f32.mrb[1].mxu0  ;;  %v4104_v49 = vadd.f32 %v3321_v34, %v371_v27  ;;  %v324_v26 = vld [vmem:[%s4606_s4 + $0x50] sm:$0xff] }
  0xf9   : > { %v701_v35 = vpop.f32.mrb[3].mxu1  ;;  %v514_v38 = vadd.f32 %v513_v36, %v361_v23  ;;  %v3322_v39 = vpop.f32.mrb[2].mxu0  ;;  %v710_v45 = vadd.f32 %v3338_v33, %v597_v44  ;;  %v322_v23 = vld [vmem:[%s4606_s4 + $0x40] sm:$0xff]  ;;  %v3938_v44 = vmov -inf  }
  0xfa   : > { %v702_v37 = vadd.f32 %v701_v35, %v587_v28  ;;  %733 = vxpose.xlu0.b32.start.end [1/1] (short) %v699_v32, 128  ;;  %v516_v40 = vpop.f32.mrb[3].mxu0  ;;  %v525_v42 = vadd.f32 %v3322_v39, %v376_v31  ;;  %342 = vst [vmem:[#allocation3] sm:$0x1] %v3938_v44  ;;  %343 = vst [vmem:[#allocation3 + $0x1] sm:$0x1] %v3938_v44 }
  0xfb   : > { %v517_v41 = vadd.f32 %v516_v40, %v366_v25  ;;  %3343 = vmatprep.subr.mxu1 %v514_v38  ;;  %344 = vst [vmem:[#allocation3 + $0x2] sm:$0x1] %v3938_v44  ;;  %345 = vst [vmem:[#allocation3 + $0x3] sm:$0x1] %v3938_v44 }
  0xfc   : > { %959 = vxpose.xlu1.b32.start.end [1/1] (short) %v702_v37, 128  ;;  %3344 = vmatpush3.msra.mxu1 %v514_v38 }
  0xfd   : > { %3369 = vmatprep.subr.mxu0 %v517_v41  ;;  %3707 = vmatprep.subr.mxu1 %v517_v41 }
  0xfe   : > { %3370 = vmatpush3.msra.mxu0 %v517_v41  ;;  %v4116_v58 = vpop.f32.mrb[4].mxu1 }
  0xff   : > { %3421 = vmatprep.subr.mxu0 %v525_v42  ;;  %v4121_v61 = vpop.f32.mrb[5].mxu1 }
 0x100   : > { %v4124_v62 = vpop.f32.mrb[6].mxu1 }
 0x101   : > { %v4126_v0 = vpop.f32.mrb[7].mxu1 }
 0x137   : > { %1184 = vxpose.xlu0.b32.start.end [1/1] (short) %v707_v43, 128 }
 0x139   : > { %1409 = vxpose.xlu1.b32.start.end [1/1] (short) %v710_v45, 128 }
 0x17a   : > { %v749_v46 = vpop.trf.xlu0 }
 0x17b   : > { %3345 = vmatprep.mubr.msk.f32.mxu1 %vm765_vm1, %v749_v46 }
 0x17c   : > { %v975_v47 = vpop.trf.xlu1 }
 0x17d   : > { %3371 = vmatprep.mubr.msk.f32.mxu0 %vm765_vm1, %v975_v47 }
 0x17e   : > { %v750_v48 = vpop.trf.xlu0 }
 0x17f   : > { %3346 = vmatmul.mubr.msk.f32.vlgmr.msra.gmra.mrb[8].mxu1 %vm765_vm1, %v750_v48 }
 0x180   : > { %3708 = vmatpush3.msra.mxu1 %v517_v41  ;;  %v976_v50 = vpop.trf.xlu1 }
 0x181   : > { %3395 = vmatprep.subr.mxu1 %v4104_v49  ;;  %3372 = vmatmul.mubr.msk.f32.vlgmr.msra.gmra.mrb[12].mxu0 %vm765_vm1, %v976_v50 }
 0x182   : > { %3422 = vmatpush3.msra.mxu0 %v525_v42  ;;  %v751_v51 = vpop.trf.xlu0 }
 0x183   : > { %3348 = vmatprep.mubr.msk.f32.mxu1 %vm765_vm1, %v751_v51 }
 0x184   : > { %v977_v52 = vpop.trf.xlu1 }
 0x185   : > { %3374 = vmatprep.mubr.msk.f32.mxu0 %vm765_vm1, %v977_v52 }
 0x186   : > { %v752_v53 = vpop.trf.xlu0 }
 0x187   : > { %3349 = vmatmul.mubr.msk.f32.gmra.mrb[10].mxu1 %vm765_vm1, %v752_v53 }
 0x188   : > { %v978_v54 = vpop.trf.xlu1 }
 0x189   : > { %3375 = vmatmul.mubr.msk.f32.gmra.mrb[14].mxu0 %vm765_vm1, %v978_v54 }
 0x18a   : > { %v753_v55 = vpop.trf.xlu0 }
 0x18b   : > { %3351 = vmatprep.mubr.msk.f32.mxu1 %vm765_vm1, %v753_v55 }
 0x18c   : > { %v979_v56 = vpop.trf.xlu1 }
 0x18d   : > { %3377 = vmatprep.mubr.msk.f32.mxu0 %vm765_vm1, %v979_v56 }
 0x18e   : > { %v754_v57 = vpop.trf.xlu0 }
 0x18f   : > { %3352 = vmatmul.mubr.msk.f32.gmra.mrb[12].mxu1 %vm765_vm1, %v754_v57 }
 0x190   : > { %v980_v59 = vpop.trf.xlu1 }
 0x191   : > { %3378 = vmatmul.mubr.msk.f32.gmra.mrb[16].mxu0 %vm765_vm1, %v980_v59 }
 0x192   : > { %v755_v63 = vpop.trf.xlu0 }
 0x193   : > { %606 = vperm.xlu1 %3788, %v331_v60   ;;  %3354 = vmatprep.mubr.msk.f32.mxu1 %vm765_vm1, %v755_v63 }
 0x194   : > { %v981_v1 = vpop.trf.xlu1 }
 0x195   : > { %3380 = vmatprep.mubr.msk.f32.mxu0 %vm765_vm1, %v981_v1 }
 0x196   : > { %v756_v3 = vpop.trf.xlu0 }
 0x197   : > { %385 = vperm.xlu1 %3788, %v319_v2   ;;  %3355 = vmatmul.mubr.msk.f32.gmra.mrb[14].mxu1 %vm765_vm1, %v756_v3 }
 0x198   : > { %v982_v4 = vpop.trf.xlu1 }
 0x199   : > { %3381 = vmatmul.mubr.msk.f32.gmra.mrb[18].mxu0 %vm765_vm1, %v982_v4  ;;  %v3939_v4 = vmov 0.0  }
 0x19a   : > { %v757_v7 = vpop.trf.xlu0  ;;  %346 = vst [vmem:[#allocation4] sm:$0x1] %v3939_v4  ;;  %347 = vst [vmem:[#allocation4 + $0x1] sm:$0x1] %v3939_v4 }
 0x19b   : > { %395 = vperm.xlu1 %3788, %v321_v5   ;;  %3357 = vmatprep.mubr.msk.f32.mxu1 %vm765_vm1, %v757_v7  ;;  %348 = vst [vmem:[#allocation4 + $0x2] sm:$0x1] %v3939_v4  ;;  %349 = vst [vmem:[#allocation4 + $0x3] sm:$0x1] %v3939_v4  ;;  %v3940_v5 = vmov 0.0|0.0  }
 0x19c   : > { %v983_v8 = vpop.trf.xlu1  ;;  %601 = vperm.xlu0 %3787, %v330_v6   ;;  %3635 = vmatprep.subr.bf16.mxu0 %v3940_v5 }
 0x19d   : > { %3383 = vmatprep.mubr.msk.f32.mxu0 %vm765_vm1, %v983_v8 }
 0x19e   : > { %v758_v11 = vpop.trf.xlu0 }
 0x19f   : > { %405 = vperm.xlu1 %3788, %v323_v9   ;;  %3358 = vmatmul.mubr.msk.f32.gmra.mrb[16].mxu1 %vm765_vm1, %v758_v11 }
 0x1a0   : > { %v984_v12 = vpop.trf.xlu1  ;;  %611 = vperm.xlu0 %3787, %v332_v10  }
 0x1a1   : > { %3384 = vmatmul.mubr.msk.f32.gmra.mrb[20].mxu0 %vm765_vm1, %v984_v12 }
 0x1a2   : > { %v759_v15 = vpop.trf.xlu0 }
 0x1a3   : > { %415 = vperm.xlu1 %3788, %v325_v13   ;;  %3360 = vmatprep.mubr.msk.f32.mxu1 %vm765_vm1, %v759_v15 }
 0x1a4   : > { %v985_v16 = vpop.trf.xlu1  ;;  %616 = vperm.xlu0 %3787, %v333_v14  }
 0x1a5   : > { %3386 = vmatprep.mubr.msk.f32.mxu0 %vm765_vm1, %v985_v16 }
 0x1a6   : > { %v760_v18 = vpop.trf.xlu0 }
 0x1a7   : > { %3361 = vmatmul.mubr.msk.f32.gmra.mrb[18].mxu1 %vm765_vm1, %v760_v18 }
 0x1a8   : > { %v986_v19 = vpop.trf.xlu1  ;;  %380 = vperm.xlu0 %3787, %v318_v17  }
 0x1a9   : > { %3387 = vmatmul.mubr.msk.f32.gmra.mrb[22].mxu0 %vm765_vm1, %v986_v19 }
 0x1aa   : > { %v761_v21 = vpop.trf.xlu0 }
 0x1ab   : > { %3363 = vmatprep.mubr.msk.f32.mxu1 %vm765_vm1, %v761_v21 }
 0x1ac   : > { %v987_v22 = vpop.trf.xlu1  ;;  %390 = vperm.xlu0 %3787, %v320_v20  }
 0x1ad   : > { %3389 = vmatprep.mubr.msk.f32.mxu0 %vm765_vm1, %v987_v22 }
 0x1ae   : > { %v762_v24 = vpop.trf.xlu0 }
 0x1af   : > { %3364 = vmatmul.mubr.msk.f32.gmra.mrb[20].mxu1 %vm765_vm1, %v762_v24 }
 0x1b0   : > { %v988_v25 = vpop.trf.xlu1  ;;  %400 = vperm.xlu0 %3787, %v322_v23  }
 0x1b1   : > { %3390 = vmatmul.mubr.msk.f32.gmra.mrb[24].mxu0 %vm765_vm1, %v988_v25 }
 0x1b2   : > { %v763_v27 = vpop.trf.xlu0 }
 0x1b3   : > { %3366 = vmatprep.mubr.msk.f32.mxu1 %vm765_vm1, %v763_v27 }
 0x1b4   : > { %v989_v28 = vpop.trf.xlu1  ;;  %410 = vperm.xlu0 %3787, %v324_v26  }
 0x1b6   : > { %v764_v29 = vpop.trf.xlu0 }
 0x1b7   : > { %3367 = vmatmul.mubr.msk.f32.gmra.mrb[22].mxu1 %vm765_vm1, %v764_v29 }
 0x1b8   : > { %v990_v30 = vpop.trf.xlu1  ;;  %3392 = vmatprep.mubr.msk.f32.mxu1 %vm765_vm1, %v989_v28 }
 0x1ba   : > { %v1200_v31 = vpop.trf.xlu0 }
 0x1bb   : > { %3393 = vmatmul.mubr.msk.f32.vlgmr.msra.gmra.mrb[24].mxu1 %vm765_vm1, %v990_v30 }
 0x1bc   : > { %3396 = vmatpush3.msra.mxu1 %v4104_v49  ;;  %v1425_v32 = vpop.trf.xlu1  ;;  %3397 = vmatprep.mubr.msk.f32.mxu1 %vm765_vm1, %v1200_v31 }
 0x1bd   : > { %3423 = vmatprep.mubr.msk.f32.mxu0 %vm765_vm1, %v1425_v32  ;;  %3611 = vmatprep.subr.bf16.mxu1 %v3940_v5 }
 0x1be   : > { %v1201_v33 = vpop.trf.xlu0 }
 0x1bf   : > { %3398 = vmatmul.mubr.msk.f32.vlgmr.msra.gmra.mrb[26].mxu1 %vm765_vm1, %v1201_v33 }
 0x1c0   : > { %v1426_v34 = vpop.trf.xlu1 }
 0x1c1   : > { %3424 = vmatmul.mubr.msk.f32.vlgmr.msra.gmra.mrb[26].mxu0 %vm765_vm1, %v1426_v34 }
 0x1c2   : > { %v1202_v35 = vpop.trf.xlu0 }
 0x1c3   : > { %3400 = vmatprep.mubr.msk.f32.mxu1 %vm765_vm1, %v1202_v35 }
 0x1c4   : > { %v1427_v36 = vpop.trf.xlu1 }
 0x1c5   : > { %3426 = vmatprep.mubr.msk.f32.mxu0 %vm765_vm1, %v1427_v36 }
 0x1c6   : > { %v1203_v37 = vpop.trf.xlu0 }
 0x1c7   : > { %3401 = vmatmul.mubr.msk.f32.gmra.mrb[28].mxu1 %vm765_vm1, %v1203_v37 }
 0x1c8   : > { %v1428_v38 = vpop.trf.xlu1 }
 0x1c9   : > { %3427 = vmatmul.mubr.msk.f32.gmra.mrb[28].mxu0 %vm765_vm1, %v1428_v38 }
 0x1ca   : > { %v1204_v39 = vpop.trf.xlu0 }
 0x1cb   : > { %3403 = vmatprep.mubr.msk.f32.mxu1 %vm765_vm1, %v1204_v39 }
 0x1cc   : > { %v1429_v40 = vpop.trf.xlu1 }
 0x1cd   : > { %3429 = vmatprep.mubr.msk.f32.mxu0 %vm765_vm1, %v1429_v40 }
 0x1ce   : > { %v1205_v41 = vpop.trf.xlu0 }
 0x1cf   : > { %3404 = vmatmul.mubr.msk.f32.gmra.mrb[30].mxu1 %vm765_vm1, %v1205_v41 }
 0x1d0   : > { %v1430_v42 = vpop.trf.xlu1 }
 0x1d1   : > { %3430 = vmatmul.mubr.msk.f32.gmra.mrb[30].mxu0 %vm765_vm1, %v1430_v42 }
 0x1d2   : > { %v1206_v43 = vpop.trf.xlu0 }
 0x1d3   : > { %3406 = vmatprep.mubr.msk.f32.mxu1 %vm765_vm1, %v1206_v43 }
 0x1d4   : > { %v1431_v45 = vpop.trf.xlu1 }
 0x1d5   : > { %3432 = vmatprep.mubr.msk.f32.mxu0 %vm765_vm1, %v1431_v45 }
 0x1d6   : > { %v1207_v46 = vpop.trf.xlu0 }
 0x1d7   : > { %3407 = vmatmul.mubr.msk.f32.gmra.mrb[32].mxu1 %vm765_vm1, %v1207_v46 }
 0x1d8   : > { %v1432_v47 = vpop.trf.xlu1 }
 0x1d9   : > { %3433 = vmatmul.mubr.msk.f32.gmra.mrb[32].mxu0 %vm765_vm1, %v1432_v47 }
 0x1da   : > { %v1208_v48 = vpop.trf.xlu0 }
 0x1db   : > { %3409 = vmatprep.mubr.msk.f32.mxu1 %vm765_vm1, %v1208_v48 }
 0x1dc   : > { %v1433_v49 = vpop.trf.xlu1 }
 0x1dd   : > { %3435 = vmatprep.mubr.msk.f32.mxu0 %vm765_vm1, %v1433_v49 }
 0x1de   : > { %v1209_v50 = vpop.trf.xlu0 }
 0x1df   : > { %3410 = vmatmul.mubr.msk.f32.gmra.mrb[34].mxu1 %vm765_vm1, %v1209_v50 }
 0x1e0   : > { %v1434_v51 = vpop.trf.xlu1 }
 0x1e1   : > { %3436 = vmatmul.mubr.msk.f32.gmra.mrb[34].mxu0 %vm765_vm1, %v1434_v51 }
 0x1e2   : > { %v1210_v52 = vpop.trf.xlu0 }
 0x1e3   : > { %3412 = vmatprep.mubr.msk.f32.mxu1 %vm765_vm1, %v1210_v52 }
 0x1e4   : > { %v1435_v53 = vpop.trf.xlu1 }
 0x1e5   : > { %3438 = vmatprep.mubr.msk.f32.mxu0 %vm765_vm1, %v1435_v53 }
 0x1e6   : > { %v1211_v54 = vpop.trf.xlu0 }
 0x1e7   : > { %3413 = vmatmul.mubr.msk.f32.gmra.mrb[36].mxu1 %vm765_vm1, %v1211_v54 }
 0x1e8   : > { %v1436_v55 = vpop.trf.xlu1 }
 0x1e9   : > { %3439 = vmatmul.mubr.msk.f32.gmra.mrb[36].mxu0 %vm765_vm1, %v1436_v55 }
 0x1ea   : > { %v1212_v56 = vpop.trf.xlu0 }
 0x1eb   : > { %3415 = vmatprep.mubr.msk.f32.mxu1 %vm765_vm1, %v1212_v56  ;;  %v1889_v56 = vlaneseq }
 0x1ec   : > { %v1437_v57 = vpop.trf.xlu1 }
 0x1ed   : > { %3441 = vmatprep.mubr.msk.f32.mxu0 %vm765_vm1, %v1437_v57 }
 0x1ee   : > { %v1213_v59 = vpop.trf.xlu0 }
 0x1ef   : > { %3416 = vmatmul.mubr.msk.f32.gmra.mrb[38].mxu1 %vm765_vm1, %v1213_v59 }
 0x1f0   : > { %v1438_v60 = vpop.trf.xlu1 }
 0x1f1   : > { %3442 = vmatmul.mubr.msk.f32.gmra.mrb[38].mxu0 %vm765_vm1, %v1438_v60 }
 0x1f2   : > { %v1214_v63 = vpop.trf.xlu0 }
 0x1f3   : > { %3418 = vmatprep.mubr.msk.f32.mxu1 %vm765_vm1, %v1214_v63 }
 0x1f4   : > { %v1439_v1 = vpop.trf.xlu1 }
 0x1f5   : > { %3444 = vmatprep.mubr.msk.f32.mxu0 %vm765_vm1, %v1439_v1 }
 0x1f6   : > { %v1215_v2 = vpop.trf.xlu0 }
 0x1f7   : > { %3419 = vmatmul.mubr.msk.f32.gmra.mrb[40].mxu1 %vm765_vm1, %v1215_v2 }
 0x1f8   : > { %v1440_v3 = vpop.trf.xlu1  ;;  %3479 = vmatprep.mubr.msk.f32.mxu1 %vm3941_vm2, %v3939_v4 }
 0x1f9   : > { %3445 = vmatmul.mubr.msk.f32.gmra.mrb[40].mxu0 %vm765_vm1, %v1440_v3  ;;  %v1890_v3 = vshrl.u32 %v1889_v56, 7 }
 0x1fa   : > { %3514 = vmatprep.mubr.msk.f32.mxu0 %vm3941_vm2, %v3939_v4 }
 0x252   : > { %v3347_v6 = vpop.f32.mrb[8].mxu1 }
 0x253   : > { %v4224_v7 = vpop.f32.mrb[9].mxu1 }
 0x254   : > { %v1785_v8 = vmax.f32 %v4224_v7, -1e+30  ;;  %v3373_v9 = vpop.f32.mrb[12].mxu0 }
 0x255   : > { %v4227_v10 = vpop.f32.mrb[13].mxu0 }
 0x256   : > { %v1786_v11 = vmax.f32 %v1785_v8, -1e+30  ;;  %v1806_v12 = vmax.f32 %v4227_v10, -1e+30 }
 0x258   : > { %v1787_v13 = vmax.f32 %v1786_v11, -1e+30  ;;  %v1807_v14 = vmax.f32 %v1806_v12, -1e+30  ;;  %v4231_v12 = vld [vmem:[#allocation3] sm:$0x1] }
 0x25a   : > { %v1788_v15 = vmax.f32 %v1787_v13, -1e+30  ;;  %v1808_v16 = vmax.f32 %v1807_v14, -1e+30  ;;  %v3350_v17 = vpop.f32.mrb[10].mxu1 }
 0x25b   : > { %v890_v18 = vpop.f32.mrb[11].mxu1 }
 0x25c   : > { %v1789_v19 = vmax.f32 %v1788_v15, -1e+30  ;;  %v1809_v20 = vmax.f32 %v1808_v16, -1e+30  ;;  %v3376_v21 = vpop.f32.mrb[14].mxu0  ;;  %v4233_v15 = vsub.s32 0, %v1890_v3 }
 0x25d   : > { %v1115_v22 = vpop.f32.mrb[15].mxu0  ;;  %v4235_v18 = vld [vmem:[#allocation3 + $0x1] sm:$0x1] }
 0x25e   : > { %v1790_v23 = vmax.f32 %v1789_v19, -1e+30  ;;  %v1810_v24 = vmax.f32 %v1809_v20, -1e+30 }
 0x260   : > { %v1791_v25 = vmax.f32 %v1790_v23, -1e+30  ;;  %v1811_v26 = vmax.f32 %v1810_v24, -1e+30 }
 0x262   : > { %v1792_v27 = vmax.f32 %v1791_v25, -1e+30  ;;  %v1812_v28 = vmax.f32 %v1811_v26, -1e+30  ;;  %v3353_v29 = vpop.f32.mrb[12].mxu1 }
 0x263   : > { %v900_v30 = vpop.f32.mrb[13].mxu1 }
 0x264   : > { %v1793_v31 = vmax.f32 %v1792_v27, -1e+30  ;;  %v1813_v32 = vmax.f32 %v1812_v28, -1e+30  ;;  %v3379_v33 = vpop.f32.mrb[16].mxu0 }
 0x265   : > { %v1125_v34 = vpop.f32.mrb[17].mxu0 }
 0x266   : > { %v1794_v35 = vmax.f32 %v1793_v31, -1e+30  ;;  %v1814_v36 = vmax.f32 %v1813_v32, -1e+30 }
 0x268   : > { %v1795_v37 = vmax.f32 %v1794_v35, -1e+30  ;;  %v1815_v38 = vmax.f32 %v1814_v36, -1e+30 }
 0x26a   : > { %v1796_v39 = vmax.f32 %v1795_v37, -1e+30  ;;  %v1816_v40 = vmax.f32 %v1815_v38, -1e+30  ;;  %v3356_v41 = vpop.f32.mrb[14].mxu1 }
 0x26b   : > { %v910_v42 = vpop.f32.mrb[15].mxu1 }
 0x26c   : > { %v1797_v43 = vmax.f32 %v1796_v39, -1e+30  ;;  %v1817_v44 = vmax.f32 %v1816_v40, -1e+30  ;;  %v3382_v45 = vpop.f32.mrb[18].mxu0 }
 0x26d   : > { %v1135_v46 = vpop.f32.mrb[19].mxu0 }
 0x26e   : > { %v1798_v47 = vmax.f32 %v1797_v43, -1e+30  ;;  %v1818_v48 = vmax.f32 %v1817_v44, -1e+30 }
 0x270   : > { %v1799_v49 = vmax.f32 %v1798_v47, -1e+30  ;;  %v1819_v50 = vmax.f32 %v1818_v48, -1e+30 }
 0x272   : > { %v1800_v51 = vrot.slane %v1799_v49, 4  ;;  %v1820_v52 = vmax.f32 %v1819_v50, -1e+30  ;;  %v3359_v53 = vpop.f32.mrb[16].mxu1 }
 0x273   : > { %v920_v54 = vpop.f32.mrb[17].mxu1 }
 0x274   : > { %v1801_v55 = vmax.f32 %v1799_v49, %v1800_v51  ;;  %v1821_v57 = vrot.slane %v1820_v52, 4  ;;  %v3385_v59 = vpop.f32.mrb[20].mxu0 }
 0x275   : > { %v1145_v60 = vpop.f32.mrb[21].mxu0 }
 0x276   : > { %v1802_v63 = vrot.slane %v1801_v55, 2  ;;  %v1822_v1 = vmax.f32 %v1820_v52, %v1821_v57 }
 0x278   : > { %v1803_v2 = vmax.f32 %v1801_v55, %v1802_v63  ;;  %v1823_v6 = vrot.slane %v1822_v1, 2 }
 0x27a   : > { %v1804_v8 = vrot.slane %v1803_v2, 1  ;;  %v1824_v9 = vmax.f32 %v1822_v1, %v1823_v6  ;;  %v3362_v11 = vpop.f32.mrb[18].mxu1 }
 0x27b   : > { %v930_v13 = vpop.f32.mrb[19].mxu1 }
 0x27c   : > { %v1805_v14 = vmax.f32 %v1803_v2, %v1804_v8  ;;  %v1825_v16 = vrot.slane %v1824_v9, 1  ;;  %v3388_v17 = vpop.f32.mrb[22].mxu0 }
 0x27d   : > { %v1155_v19 = vpop.f32.mrb[23].mxu0 }
 0x27e   : > { %v4238_v20 = vmax.f32 %v4231_v12, %v1805_v14  ;;  %v1826_v21 = vmax.f32 %v1824_v9, %v1825_v16 }
 0x280   : > { %v1892_v22 = vrot.slane %v4238_v20, %v4233_v15  ;;  %2521 = vst [vmem:[#allocation3] sm:$0x1] %v4238_v20  ;;  %v4244_v23 = vmax.f32 %v4235_v18, %v1826_v21 }
 0x282   : > { %v1909_v24 = vsub.f32 %v4224_v7, %v1892_v22  ;;  %v1910_v25 = vsub.f32 -1e+30, %v1892_v22  ;;  %2522 = vst [vmem:[#allocation3 + $0x1] sm:$0x1] %v4244_v23  ;;  %v3365_v26 = vpop.f32.mrb[20].mxu1  ;;  %v1896_v27 = vrot.slane %v4244_v23, %v4233_v15 }
 0x283   : > { %v940_v28 = vpop.f32.mrb[21].mxu1 }
 0x284   : > { %v1973_v29 = vmul.f32 1.442695, %v1909_v24  ;;  %v1975_v30 = vmul.f32 1.442695, %v1910_v25  ;;  %v1925_v31 = vsub.f32 %v4227_v10, %v1896_v27  ;;  %v1926_v32 = vsub.f32 -1e+30, %v1896_v27 }
 0x285   : > { %v3391_v33 = vpop.f32.mrb[24].mxu0 }
 0x286   : > { %3809 = vpow2.f32 %v1973_v29  ;;  %v1165_v34 = vpop.f32.mrb[25].mxu0  ;;  %v2005_v35 = vmul.f32 1.442695, %v1925_v31  ;;  %v2007_v36 = vmul.f32 1.442695, %v1926_v32 }
 0x287   : > { %3811 = vpow2.f32 %v1975_v30 }
 0x288   : > { %3813 = vpow2.f32 %v2005_v35 }
 0x289   : > { %3815 = vpow2.f32 %v2007_v36 }
 0x28a   : > { %v3368_v7 = vpop.f32.mrb[22].mxu1 }
 0x28b   : > { %v950_v37 = vpop.f32.mrb[23].mxu1 }
 0x28e   : > { %v3394_v38 = vpop.f32.mrb[24].mxu1 }
 0x28f   : > { %v1175_v39 = vpop.f32.mrb[25].mxu1 }
 0x290   : > { %v3810_v40 = vpop.eup %3809 }
 0x291   : > { %v4251_v41 = vpop.eup %3811 }
 0x292   : > { %v2109_v42 = vadd.f32 %v4251_v41, %v3810_v40  ;;  %v3399_v43 = vpop.f32.mrb[26].mxu1  ;;  %v3612_v10 = vpack.c.bf16 %v4251_v41, %v3810_v40  ;;  %v3814_v44 = vpop.eup %3813  ;;  %v4270_v57 = vpack.c.bf16 %v4251_v41, %v4251_v41 }
 0x293   : > { %v4255_v45 = vpop.f32.mrb[27].mxu1  ;;  %v4257_v46 = vpop.eup %3815  ;;  %v1873_v43 = vsub.f32 %v4231_v12, %v4238_v20 }
 0x294   : > { %v2110_v47 = vadd.f32 %v4251_v41, %v2109_v42  ;;  %v1827_v48 = vmax.f32 %v4255_v45, -1e+30  ;;  %3613 = vmatpush3.bf16.msra.mxu1 %v3612_v10  ;;  %v3425_v49 = vpop.f32.mrb[26].mxu0  ;;  %v2130_v50 = vadd.f32 %v4257_v46, %v3814_v44  ;;  %v3636_v52 = vpack.c.bf16 %v4257_v46, %v3814_v44 }
 0x295   : > { %v4262_v51 = vpop.f32.mrb[27].mxu0  ;;  %3614 = vmatprep.subr.bf16.mxu1 %v3940_v5  ;;  %v4279_v3 = vpack.c.bf16 %v4257_v46, %v4257_v46  ;;  %v1877_v20 = vmul.f32 1.442695, %v1873_v43 }
 0x296   : > { %v2111_v53 = vadd.f32 %v4251_v41, %v2110_v47  ;;  %v1828_v54 = vmax.f32 %v1827_v48, -1e+30  ;;  %v1848_v55 = vmax.f32 %v4262_v51, -1e+30  ;;  %v2131_v59 = vadd.f32 %v4257_v46, %v2130_v50  ;;  %3637 = vmatpush3.bf16.msra.mxu0 %v3636_v52 }
 0x297   : > { %3638 = vmatprep.subr.bf16.mxu0 %v3940_v5  ;;  %v1874_v50 = vsub.f32 %v4235_v18, %v4244_v23  ;;  %3817 = vpow2.f32 %v1877_v20 }
 0x298   : > { %v2112_v60 = vadd.f32 %v4251_v41, %v2111_v53  ;;  %v1829_v63 = vmax.f32 %v1828_v54, -1e+30  ;;  %v1849_v1 = vmax.f32 %v1848_v55, -1e+30  ;;  %3616 = vmatpush3.bf16.msra.mxu1 %v4270_v57  ;;  %v2132_v2 = vadd.f32 %v4257_v46, %v2131_v59 }
 0x299   : > { %3617 = vmatprep.subr.bf16.mxu1 %v3940_v5 }
 0x29a   : > { %v2113_v6 = vadd.f32 %v4251_v41, %v2112_v60  ;;  %v1830_v8 = vmax.f32 %v1829_v63, -1e+30  ;;  %v1850_v9 = vmax.f32 %v1849_v1, -1e+30  ;;  %v3402_v11 = vpop.f32.mrb[28].mxu1  ;;  %v2133_v13 = vadd.f32 %v4257_v46, %v2132_v2  ;;  %3640 = vmatpush3.bf16.msra.mxu0 %v4279_v3 }
 0x29b   : > { %v1340_v14 = vpop.f32.mrb[29].mxu1  ;;  %3641 = vmatprep.subr.bf16.mxu0 %v3940_v5  ;;  %v1879_v63 = vmul.f32 1.442695, %v1874_v50 }
 0x29c   : > { %v2114_v16 = vadd.f32 %v4251_v41, %v2113_v6  ;;  %v1831_v17 = vmax.f32 %v1830_v8, -1e+30  ;;  %v1851_v19 = vmax.f32 %v1850_v9, -1e+30  ;;  %3619 = vmatpush3.bf16.msra.mxu1 %v4270_v57  ;;  %v3428_v21 = vpop.f32.mrb[28].mxu0  ;;  %v2134_v22 = vadd.f32 %v4257_v46, %v2133_v13 }
 0x29d   : > { %3620 = vmatprep.subr.bf16.mxu1 %v3940_v5  ;;  %v1565_v24 = vpop.f32.mrb[29].mxu0  ;;  %3819 = vpow2.f32 %v1879_v63 }
 0x29e   : > { %v2115_v25 = vadd.f32 %v4251_v41, %v2114_v16  ;;  %v1832_v26 = vmax.f32 %v1831_v17, -1e+30  ;;  %v1852_v27 = vmax.f32 %v1851_v19, -1e+30  ;;  %v2135_v28 = vadd.f32 %v4257_v46, %v2134_v22  ;;  %3643 = vmatpush3.bf16.msra.mxu0 %v4279_v3  ;;  %v602_v16 = vpop.permute.xlu0 %601 }
 0x29f   : > { %3644 = vmatprep.subr.bf16.mxu0 %v3940_v5 }
 0x2a0   : > { %v2116_v29 = vadd.f32 %v4251_v41, %v2115_v25  ;;  %v1833_v30 = vmax.f32 %v1832_v26, -1e+30  ;;  %v1853_v31 = vmax.f32 %v1852_v27, -1e+30  ;;  %3622 = vmatpush3.bf16.msra.mxu1 %v4270_v57  ;;  %v2136_v32 = vadd.f32 %v4257_v46, %v2135_v28  ;;  %v607_v27 = vpop.permute.xlu1 %606 }
 0x2a1   : > { %3623 = vmatprep.subr.bf16.mxu1 %v3940_v5  ;;  %v715_v28 = vadd.f32 %v4121_v61, %v602_v16 }
 0x2a2   : > { %v2117_v33 = vadd.f32 %v4251_v41, %v2116_v29  ;;  %v1834_v34 = vmax.f32 %v1833_v30, -1e+30  ;;  %v1854_v35 = vmax.f32 %v1853_v31, -1e+30  ;;  %v3405_v36 = vpop.f32.mrb[30].mxu1  ;;  %v2137_v7 = vadd.f32 %v4257_v46, %v2136_v32  ;;  %3646 = vmatpush3.bf16.msra.mxu0 %v4279_v3 }
 0x2a3   : > { %v1350_v37 = vpop.f32.mrb[31].mxu1  ;;  %3647 = vmatprep.subr.bf16.mxu0 %v3940_v5 }
 0x2a4   : > { %v2118_v38 = vadd.f32 %v4251_v41, %v2117_v33  ;;  %v1835_v39 = vmax.f32 %v1834_v34, -1e+30  ;;  %v1855_v40 = vmax.f32 %v1854_v35, -1e+30  ;;  %3625 = vmatpush3.bf16.msra.mxu1 %v4270_v57  ;;  %v3431_v42 = vpop.f32.mrb[30].mxu0  ;;  %v2138_v10 = vadd.f32 %v4257_v46, %v2137_v7 }
 0x2a5   : > { %3626 = vmatprep.subr.bf16.mxu1 %v3940_v5  ;;  %v1575_v44 = vpop.f32.mrb[31].mxu0 }
 0x2a6   : > { %v2119_v47 = vadd.f32 %v4251_v41, %v2118_v38  ;;  %v1836_v48 = vmax.f32 %v1835_v39, -1e+30  ;;  %v1856_v49 = vmax.f32 %v1855_v40, -1e+30  ;;  %v2139_v52 = vadd.f32 %v4257_v46, %v2138_v10  ;;  %3649 = vmatpush3.bf16.msra.mxu0 %v4279_v3 }
 0x2a7   : > { %3650 = vmatprep.subr.bf16.mxu0 %v3940_v5 }
 0x2a8   : > { %v2120_v53 = vadd.f32 %v4251_v41, %v2119_v47  ;;  %v1837_v54 = vmax.f32 %v1836_v48, -1e+30  ;;  %v1857_v12 = vmax.f32 %v1856_v49, -1e+30  ;;  %3628 = vmatpush3.bf16.msra.mxu1 %v4270_v57  ;;  %v2140_v55 = vadd.f32 %v4257_v46, %v2139_v52 }
 0x2a9   : > { %3629 = vmatprep.subr.bf16.mxu1 %v3940_v5 }
 0x2aa   : > { %v2121_v59 = vadd.f32 %v4251_v41, %v2120_v53  ;;  %v1838_v18 = vmax.f32 %v1837_v54, -1e+30  ;;  %v1858_v23 = vmax.f32 %v1857_v12, -1e+30  ;;  %v3408_v60 = vpop.f32.mrb[32].mxu1  ;;  %v2141_v1 = vadd.f32 %v4257_v46, %v2140_v55  ;;  %3652 = vmatpush3.bf16.msra.mxu0 %v4279_v3 }
 0x2ab   : > { %v1360_v2 = vpop.f32.mrb[33].mxu1  ;;  %3653 = vmatprep.subr.bf16.mxu0 %v3940_v5  ;;  %v2102_v12 = vld [vmem:[#allocation4 + $0x1] sm:$0x1]  ;;  %v4346_v55 = vld [vmem:[#allocation3 + $0x2] sm:$0x1] }
 0x2ac   : > { %v2122_v6 = vadd.f32 %v4251_v41, %v2121_v59  ;;  %v1839_v8 = vmax.f32 %v1838_v18, -1e+30  ;;  %v1859_v9 = vmax.f32 %v1858_v23, -1e+30  ;;  %3631 = vmatpush3.bf16.msra.mxu1 %v4270_v57  ;;  %v3434_v11 = vpop.f32.mrb[32].mxu0  ;;  %v2142_v13 = vadd.f32 %v4257_v46, %v2141_v1 }
 0x2ad   : > { %3632 = vmatprep.subr.bf16.mxu1 %v3940_v5  ;;  %v1585_v14 = vpop.f32.mrb[33].mxu0  ;;  %v4348_v1 = vld [vmem:[#allocation3 + $0x3] sm:$0x1] }
 0x2ae   : > { %v2123_v17 = vadd.f32 %v4251_v41, %v2122_v6  ;;  %v1840_v19 = vmax.f32 %v1839_v8, -1e+30  ;;  %v1860_v21 = vmax.f32 %v1859_v9, -1e+30  ;;  %v2143_v22 = vadd.f32 %v4257_v46, %v2142_v13  ;;  %3655 = vmatpush3.bf16.msra.mxu0 %v4279_v3 }
 0x2af   : > { %3656 = vmatprep.subr.bf16.mxu0 %v3940_v5 }
 0x2b0   : > { %v2124_v24 = vrot.slane %v2123_v17, 4  ;;  %v1841_v25 = vmax.f32 %v1840_v19, -1e+30  ;;  %v1861_v26 = vmax.f32 %v1860_v21, -1e+30  ;;  %3634 = vmatpush3.bf16.msra.mxu1 %v4270_v57  ;;  %v2144_v29 = vadd.f32 %v4257_v46, %v2143_v22 }
 0x2b1   : > { %3659 = vmatprep.subr.bf16.mxu1 %v3940_v5  ;;  %v718_v57 = vadd.f32 %v4126_v0, %v607_v27  ;;  %v2101_v0 = vld [vmem:[#allocation4] sm:$0x1] }
 0x2b2   : > { %v2125_v41 = vadd.f32 %v2124_v24, %v2123_v17  ;;  %v1842_v30 = vrot.slane %v1841_v25, 4  ;;  %v1862_v31 = vmax.f32 %v1861_v26, -1e+30  ;;  %v3411_v32 = vpop.f32.mrb[34].mxu1  ;;  %v2145_v33 = vrot.slane %v2144_v29, 4  ;;  %3658 = vmatpush3.bf16.msra.mxu0 %v4279_v3  ;;  %v4339_v3 = vpop.eup %3817 }
 0x2b3   : > { %3480 = vmatmul.mubr.f32.vlgmr.msra.gmra.mrb[42].mxu1 %v715_v28  ;;  %v1370_v34 = vpop.f32.mrb[35].mxu1  ;;  %3683 = vmatprep.subr.bf16.mxu0 %v3940_v5  ;;  %v4343_v48 = vpop.eup %3819  ;;  %v2105_v54 = vmul.f32 %v4339_v3, %v2101_v0 }
 0x2b4   : > { %v2126_v35 = vrot.slane %v2125_v41, 2  ;;  %v1843_v36 = vmax.f32 %v1841_v25, %v1842_v30  ;;  %v1863_v7 = vrot.slane %v1862_v31, 4  ;;  %3549 = vmatprep.mubr.msk.f32.mxu1 %vm3941_vm2, %v3939_v4  ;;  %v3437_v61 = vpop.f32.mrb[34].mxu0  ;;  %v2146_v46 = vadd.f32 %v2145_v33, %v2144_v29 }
 0x2b5   : > { %v1595_v37 = vpop.f32.mrb[35].mxu0  ;;  %3515 = vmatmul.mubr.f32.vlgmr.msra.gmra.mrb[42].mxu0 %v718_v57  ;;  %v2106_v6 = vmul.f32 %v4343_v48, %v2102_v12 }
 0x2b6   : > { %v2127_v38 = vadd.f32 %v2126_v35, %v2125_v41  ;;  %v1844_v39 = vrot.slane %v1843_v36, 2  ;;  %v1864_v40 = vmax.f32 %v1862_v31, %v1863_v7  ;;  %v2147_v42 = vrot.slane %v2146_v46, 2  ;;  %3584 = vmatprep.mubr.msk.f32.mxu0 %vm3941_vm2, %v3939_v4 }
 0x2b8   : > { %v2128_v43 = vrot.slane %v2127_v38, 1  ;;  %v1845_v10 = vmax.f32 %v1843_v36, %v1844_v39  ;;  %v1865_v44 = vrot.slane %v1864_v40, 2  ;;  %v2148_v47 = vadd.f32 %v2147_v42, %v2146_v46 }
 0x2ba   : > { %v2129_v49 = vadd.f32 %v2128_v43, %v2127_v38  ;;  %v1846_v50 = vrot.slane %v1845_v10, 1  ;;  %v1866_v52 = vmax.f32 %v1864_v40, %v1865_v44  ;;  %v3414_v53 = vpop.f32.mrb[36].mxu1  ;;  %v2149_v20 = vrot.slane %v2148_v47, 1 }
 0x2bb   : > { %v1380_v59 = vpop.f32.mrb[37].mxu1 }
 0x2bc   : > { %v1847_v18 = vmax.f32 %v1845_v10, %v1846_v50  ;;  %v1867_v4 = vrot.slane %v1866_v52, 1  ;;  %v3440_v23 = vpop.f32.mrb[36].mxu0  ;;  %v2193_v60 = vadd.f32 %v2129_v49, %v2105_v54  ;;  %v2150_v63 = vadd.f32 %v2149_v20, %v2148_v47 }
 0x2bd   : > { %v1605_v2 = vpop.f32.mrb[37].mxu0 }
 0x2be   : > { %v4352_v8 = vmax.f32 %v4346_v55, %v1847_v18  ;;  %v1868_v9 = vmax.f32 %v1866_v52, %v1867_v4  ;;  %2197 = vst [vmem:[#allocation4] sm:$0x1] %v2193_v60  ;;  %v2194_v11 = vadd.f32 %v2150_v63, %v2106_v6 }
 0x2c0   : > { %v1900_v13 = vrot.slane %v4352_v8, %v4233_v15  ;;  %2523 = vst [vmem:[#allocation3 + $0x2] sm:$0x1] %v4352_v8  ;;  %v4358_v14 = vmax.f32 %v4348_v1, %v1868_v9  ;;  %2198 = vst [vmem:[#allocation4 + $0x1] sm:$0x1] %v2194_v11  ;;  %v1875_v18 = vsub.f32 %v4346_v55, %v4352_v8  ;;  %v612_v9 = vpop.permute.xlu0 %611 }
 0x2c2   : > { %v1941_v16 = vsub.f32 %v4255_v45, %v1900_v13  ;;  %v1942_v17 = vsub.f32 -1e+30, %v1900_v13  ;;  %2524 = vst [vmem:[#allocation3 + $0x3] sm:$0x1] %v4358_v14  ;;  %v3417_v19 = vpop.f32.mrb[38].mxu1  ;;  %v1904_v21 = vrot.slane %v4358_v14, %v4233_v15  ;;  %v1876_v2 = vsub.f32 %v4348_v1, %v4358_v14 }
 0x2c3   : > { %v1390_v22 = vpop.f32.mrb[39].mxu1  ;;  %v1881_v6 = vmul.f32 1.442695, %v1875_v18 }
 0x2c4   : > { %v2037_v24 = vmul.f32 1.442695, %v1941_v16  ;;  %v2039_v25 = vmul.f32 1.442695, %v1942_v17  ;;  %v1957_v26 = vsub.f32 %v4262_v51, %v1904_v21  ;;  %v1958_v27 = vsub.f32 -1e+30, %v1904_v21  ;;  %v617_v22 = vpop.permute.xlu0 %616 }
 0x2c5   : > { %v3443_v28 = vpop.f32.mrb[38].mxu0  ;;  %v1883_v16 = vmul.f32 1.442695, %v1876_v2  ;;  %v723_v21 = vadd.f32 %v4116_v58, %v612_v9 }
 0x2c6   : > { %3821 = vpow2.f32 %v2037_v24  ;;  %v1615_v29 = vpop.f32.mrb[39].mxu0  ;;  %v2069_v41 = vmul.f32 1.442695, %v1957_v26  ;;  %v2071_v30 = vmul.f32 1.442695, %v1958_v27  ;;  %v726_v27 = vadd.f32 %v4124_v62, %v617_v22  ;;  %v3803_v62 = vld [vmem:[%s4604_s2 + $0x50] sm:$0xff]  }
 0x2c7   : > { %3823 = vpow2.f32 %v2039_v25  ;;  %v3805_v22 = vld [vmem:[%s4604_s2 + $0x60] sm:$0xff]  }
 0x2c8   : > { %3825 = vpow2.f32 %v2069_v41 }
 0x2c9   : > { %3827 = vpow2.f32 %v2071_v30 }
 0x2ca   : > { %v3420_v45 = vpop.f32.mrb[40].mxu1  ;;  %3829 = vpow2.f32 %v1881_v6 }
 0x2cb   : > { %v1400_v31 = vpop.f32.mrb[41].mxu1  ;;  %3831 = vpow2.f32 %v1883_v16 }
 0x2cc   : > { %v3446_v32 = vpop.f32.mrb[40].mxu0  ;;  %v2103_v31 = vld [vmem:[#allocation4 + $0x2] sm:$0x1] }
 0x2cd   : > { %v1625_v33 = vpop.f32.mrb[41].mxu0 }
 0x2d0   : > { %v3822_v34 = vpop.eup %3821 }
 0x2d1   : > { %v4365_v57 = vpop.eup %3823 }
 0x2d2   : > { %v2151_v35 = vadd.f32 %v4365_v57, %v3822_v34  ;;  %v3660_v51 = vpack.c.bf16 %v4365_v57, %v3822_v34  ;;  %v3826_v36 = vpop.eup %3825  ;;  %v3663_v39 = vpack.c.bf16 %v4365_v57, %v4365_v57 }
 0x2d3   : > { %v4369_v7 = vpop.eup %3827 }
 0x2d4   : > { %v2152_v61 = vadd.f32 %v4365_v57, %v2151_v35  ;;  %3661 = vmatpush3.bf16.msra.mxu1 %v3660_v51  ;;  %v2172_v46 = vadd.f32 %v4369_v7, %v3826_v36  ;;  %v3684_v37 = vpack.c.bf16 %v4369_v7, %v3826_v36  ;;  %v3687_v43 = vpack.c.bf16 %v4369_v7, %v4369_v7  ;;  %v3830_v30 = vpop.eup %3829 }
 0x2d5   : > { %3662 = vmatprep.subr.bf16.mxu1 %v3940_v5  ;;  %v3832_v33 = vpop.eup %3831  ;;  %v2107_v34 = vmul.f32 %v3830_v30, %v2103_v31  ;;  %v2500_v18 = vrot.slane %v3830_v30, %v4233_v15 }
 0x2d6   : > { %v2153_v38 = vadd.f32 %v4365_v57, %v2152_v61  ;;  %v2173_v40 = vadd.f32 %v4369_v7, %v2172_v46  ;;  %3685 = vmatpush3.bf16.msra.mxu0 %v3684_v37  ;;  %v2528_v46 = vld [vmem:[#allocation4] sm:$0x1]  ;;  %v2529_v37 = vld [vmem:[#allocation4 + $0x1] sm:$0x1] }
 0x2d7   : > { %3686 = vmatprep.subr.bf16.mxu0 %v3940_v5  ;;  %3833 = vrcp.f32 %v2528_v46 }
 0x2d8   : > { %v2154_v42 = vadd.f32 %v4365_v57, %v2153_v38  ;;  %3664 = vmatpush3.bf16.msra.mxu1 %v3663_v39  ;;  %v2174_v0 = vadd.f32 %v4369_v7, %v2173_v40  ;;  %3835 = vrcp.f32 %v2529_v37  ;;  %v2492_v38 = vrot.slane %v4339_v3, %v4233_v15 }
 0x2d9   : > { %3665 = vmatprep.subr.bf16.mxu1 %v3940_v5 }
 0x2da   : > { %v2155_v10 = vadd.f32 %v4365_v57, %v2154_v42  ;;  %v2175_v44 = vadd.f32 %v4369_v7, %v2174_v0  ;;  %3688 = vmatpush3.bf16.msra.mxu0 %v3687_v43  ;;  %v2509_v40 = vmul.f32 0.0, %v2492_v38 }
 0x2db   : > { %3689 = vmatprep.subr.bf16.mxu0 %v3940_v5 }
 0x2dc   : > { %v2156_v47 = vadd.f32 %v4365_v57, %v2155_v10  ;;  %3667 = vmatpush3.bf16.msra.mxu1 %v3663_v39  ;;  %v2176_v49 = vadd.f32 %v4369_v7, %v2175_v44 }
 0x2dd   : > { %3668 = vmatprep.subr.bf16.mxu1 %v3940_v5 }
 0x2de   : > { %v2157_v50 = vadd.f32 %v4365_v57, %v2156_v47  ;;  %v2177_v52 = vadd.f32 %v4369_v7, %v2176_v49  ;;  %3691 = vmatpush3.bf16.msra.mxu0 %v3687_v43 }
 0x2df   : > { %3692 = vmatprep.subr.bf16.mxu0 %v3940_v5 }
 0x2e0   : > { %v2158_v53 = vadd.f32 %v4365_v57, %v2157_v50  ;;  %3670 = vmatpush3.bf16.msra.mxu1 %v3663_v39  ;;  %v2178_v54 = vadd.f32 %v4369_v7, %v2177_v52 }
 0x2e1   : > { %3671 = vmatprep.subr.bf16.mxu1 %v3940_v5  ;;  %v3834_v42 = vpop.eup %3833 }
 0x2e2   : > { %v2159_v12 = vadd.f32 %v4365_v57, %v2158_v53  ;;  %v2179_v20 = vadd.f32 %v4369_v7, %v2178_v54  ;;  %3694 = vmatpush3.bf16.msra.mxu0 %v3687_v43  ;;  %v2547_v50 = vrot.slane %v3834_v42, %v4233_v15 }
 0x2e3   : > { %3695 = vmatprep.subr.bf16.mxu0 %v3940_v5 }
 0x2e4   : > { %v2160_v59 = vadd.f32 %v4365_v57, %v2159_v12  ;;  %3673 = vmatpush3.bf16.msra.mxu1 %v3663_v39  ;;  %v2180_v4 = vadd.f32 %v4369_v7, %v2179_v20 }
 0x2e5   : > { %3674 = vmatprep.subr.bf16.mxu1 %v3940_v5 }
 0x2e6   : > { %v2161_v23 = vadd.f32 %v4365_v57, %v2160_v59  ;;  %v2181_v60 = vadd.f32 %v4369_v7, %v2180_v4  ;;  %3697 = vmatpush3.bf16.msra.mxu0 %v3687_v43  ;;  %v2504_v4 = vrot.slane %v3832_v33, %v4233_v15 }
 0x2e7   : > { %3698 = vmatprep.subr.bf16.mxu0 %v3940_v5 }
 0x2e8   : > { %v2162_v63 = vadd.f32 %v4365_v57, %v2161_v23  ;;  %3676 = vmatpush3.bf16.msra.mxu1 %v3663_v39  ;;  %v2182_v55 = vadd.f32 %v4369_v7, %v2181_v60  ;;  %v2511_v23 = vmul.f32 0.0, %v2500_v18 }
 0x2e9   : > { %3677 = vmatprep.subr.bf16.mxu1 %v3940_v5 }
 0x2ea   : > { %v2163_v8 = vadd.f32 %v4365_v57, %v2162_v63  ;;  %v2183_v11 = vadd.f32 %v4369_v7, %v2182_v55  ;;  %3700 = vmatpush3.bf16.msra.mxu0 %v3687_v43 }
 0x2eb   : > { %3701 = vmatprep.subr.bf16.mxu0 %v3940_v5 }
 0x2ec   : > { %v2164_v13 = vadd.f32 %v4365_v57, %v2163_v8  ;;  %3679 = vmatpush3.bf16.msra.mxu1 %v3663_v39  ;;  %v2184_v1 = vadd.f32 %v4369_v7, %v2183_v11  ;;  %v2512_v8 = vmul.f32 0.0, %v2504_v4 }
 0x2ed   : > { %3680 = vmatprep.subr.bf16.mxu1 %v3940_v5 }
 0x2ee   : > { %v2165_v14 = vadd.f32 %v4365_v57, %v2164_v13  ;;  %v2185_v17 = vadd.f32 %v4369_v7, %v2184_v1  ;;  %3703 = vmatpush3.bf16.msra.mxu0 %v3687_v43  ;;  %v2104_v57 = vld [vmem:[#allocation4 + $0x3] sm:$0x1] }
 0x2ef   : > { %3704 = vmatprep.subr.bf16.mxu0 %v3940_v5 }
 0x2f0   : > { %v2166_v19 = vrot.slane %v2165_v14, 4  ;;  %3682 = vmatpush3.bf16.msra.mxu1 %v3663_v39  ;;  %v2186_v24 = vadd.f32 %v4369_v7, %v2185_v17  ;;  %v2108_v7 = vmul.f32 %v3832_v33, %v2104_v57  ;;  %v2496_v39 = vrot.slane %v4343_v48, %v4233_v15 }
 0x2f2   : > { %v2167_v25 = vadd.f32 %v2166_v19, %v2165_v14  ;;  %v2187_v26 = vrot.slane %v2186_v24, 4  ;;  %3706 = vmatpush3.bf16.msra.mxu0 %v3687_v43  ;;  %v3836_v43 = vpop.eup %3835  ;;  %v2510_v47 = vmul.f32 0.0, %v2496_v39 }
 0x2f3   : > { %3550 = vmatmul.mubr.f32.vlgmr.msra.gmra.mrb[44].mxu1 %v723_v21  ;;  %v2551_v53 = vrot.slane %v3836_v43, %v4233_v15  ;;  %v3804_v21 = vld [vmem:[%s4604_s2 + $0x58] sm:$0xff]  }
 0x2f4   : > { %v2168_v28 = vrot.slane %v2167_v25, 2  ;;  %v2188_v29 = vadd.f32 %v2187_v26, %v2186_v24  ;;  %v381_v24 = vpop.permute.xlu0 %380  ;;  %v4452_v26 = vand.u32 127, %v1889_v56 }
 0x2f5   : > { %3585 = vmatmul.mubr.f32.vlgmr.msra.gmra.mrb[44].mxu0 %v726_v27 }
 0x2f6   : > { %v2169_v41 = vadd.f32 %v2168_v28, %v2167_v25  ;;  %v2189_v45 = vrot.slane %v2188_v29, 2  ;;  %3591 = vmatprep.mubr.msk.bf16.mxu0 %vm460_vm0, %v3803_v62  ;;  %v386_v25 = vpop.permute.xlu1 %385  ;;  %vm2709_vm3 = vcmp.lt.s32.totalorder %v4452_v26, 8  ;;  %v335_v26 = vld [vmem:[%s4606_s4 + $0xa8] sm:$0xff] }
 0x2f8   : > { %v2170_v32 = vrot.slane %v2169_v41, 1  ;;  %v2190_v5 = vadd.f32 %v2189_v45, %v2188_v29  ;;  %v391_v27 = vpop.permute.xlu0 %390 }
 0x2fa   : > { %v2171_v58 = vadd.f32 %v2170_v32, %v2169_v41  ;;  %v2191_v35 = vrot.slane %v2190_v5, 1  ;;  %v396_v45 = vpop.permute.xlu1 %395 }
 0x2fc   : > { %v2195_v51 = vadd.f32 %v2171_v58, %v2107_v34  ;;  %v2192_v36 = vadd.f32 %v2191_v35, %v2190_v5  ;;  %v401_v58 = vpop.permute.xlu0 %400 }
 0x2fe   : > { %2199 = vst [vmem:[#allocation4 + $0x2] sm:$0x1] %v2195_v51  ;;  %v2196_v61 = vadd.f32 %v2192_v36, %v2108_v7  ;;  %v406_v51 = vpop.permute.xlu1 %405 }
 0x300   : > { %2200 = vst [vmem:[#allocation4 + $0x3] sm:$0x1] %v2196_v61  ;;  %v411_v62 = vpop.permute.xlu0 %410 }
 0x302   : > { %v416_v42 = vpop.permute.xlu1 %415 }
 0x305   : > { %v2530_v48 = vld [vmem:[#allocation4 + $0x2] sm:$0x1] }
 0x306   : > { %3837 = vrcp.f32 %v2530_v48 }
 0x307   : > { %v2531_v59 = vld [vmem:[#allocation4 + $0x3] sm:$0x1] }
 0x308   : > { %3839 = vrcp.f32 %v2531_v59 }
 0x310   : > { %v3838_v60 = vpop.eup %3837 }
 0x311   : > { %v2555_v11 = vrot.slane %v3838_v60, %v4233_v15 }
 0x312   : > { %v3840_v2 = vpop.eup %3839 }
 0x313   : > { %v2559_v16 = vrot.slane %v3840_v2, %v4233_v15  ;;  %v3806_v15 = vld [vmem:[%s4604_s2 + $0x68] sm:$0xff]  }
 0x386   : > { %v2267_v0 = vpop.f32.mrb[42].mxu1 }
 0x387   : > { %v2513_v10 = vadd.f32 %v2509_v40, %v2267_v0  ;;  %v3481_v44 = vpop.f32.mrb[43].mxu1 }
 0x388   : > { %v2337_v49 = vpop.f32.mrb[42].mxu0 }
 0x389   : > { %v2514_v52 = vadd.f32 %v2510_v47, %v2337_v49  ;;  %v3516_v54 = vpop.f32.mrb[43].mxu0  ;;  %v2564_v12 = vmul.f32 %v2547_v50, %v2513_v10 }
 0x38b   : > { %v2565_v20 = vmul.f32 %v2551_v53, %v2514_v52 }
 0x38d   : > { %v2568_v3 = vpack.c.bf16 %v2565_v20, %v2564_v12 }
 0x38f   : > { %3587 = vmatprep.subr.bf16.mxu0 %v2568_v3 }
 0x390   : > { %3588 = vmatpush3.bf16.msra.mxu0 %v2568_v3 }
 0x3c6   : > { %v2407_v63 = vpop.f32.mrb[44].mxu1 }
 0x3c7   : > { %v2515_v6 = vadd.f32 %v2511_v23, %v2407_v63  ;;  %v3551_v55 = vpop.f32.mrb[45].mxu1 }
 0x3c8   : > { %v2477_v9 = vpop.f32.mrb[44].mxu0 }
 0x3c9   : > { %v2516_v13 = vadd.f32 %v2512_v8, %v2477_v9  ;;  %v3586_v1 = vpop.f32.mrb[45].mxu0  ;;  %v2566_v14 = vmul.f32 %v2555_v11, %v2515_v6 }
 0x3cb   : > { %v2567_v17 = vmul.f32 %v2559_v16, %v2516_v13 }
 0x3cd   : > { %v2569_v19 = vpack.c.bf16 %v2567_v17, %v2566_v14 }
 0x3cf   : > { %3589 = vmatprep.subr.bf16.mxu0 %v2569_v19 }
 0x3d0   : > { %3590 = vmatpush3.bf16.msra.mxu0 %v2569_v19 }
 0x3d3   : > { %3592 = vmatmul.mubr.msk.bf16.vlgmr.msra.gmra.mrb[4].mxu0 %vm460_vm0, %v3804_v21 }
 0x3d4   : > { %3595 = vmatprep.mubr.msk.bf16.mxu0 %vm460_vm0, %v3805_v22 }
 0x3db   : > { %3596 = vmatmul.mubr.msk.bf16.gmra.mrb[8].mxu0 %vm460_vm0, %v3806_v15 }
 0x4a6   : > { %v3593_v28 = vpop.f32.mrb[4].mxu0 }
 0x4a7   : > { %v2636_v29 = vpop.f32.mrb[5].mxu0  ;;  %v3709_v32 = vadd.f32 %v3593_v28, %v391_v27 }
 0x4a8   : > { %v3710_v41 = vadd.f32 %v2636_v29, %v381_v24  ;;  %v3594_v30 = vpop.f32.mrb[6].mxu0 }
 0x4a9   : > { %v2639_v31 = vpop.f32.mrb[7].mxu0  ;;  %v3711_v34 = vadd.f32 %v3594_v30, %v396_v45  ;;  %v2714_v35 = vsel %vm2709_vm3, %v3709_v32, 0.0 }
 0x4aa   : > { %v3712_v5 = vadd.f32 %v2639_v31, %v386_v25  ;;  %v2712_v33 = vsel %vm2709_vm3, %v3710_v41, 0.0 }
 0x4ab   : > { %2720 = vadd.xlane.f32.xlu0 %v2712_v33  ;;  %v2715_v39 = vsel %vm2709_vm3, %v3711_v34, 0.0  ;;  %v337_v33 = vld [vmem:[%s4606_s4 + $0xb8] sm:$0xff] }
 0x4ac   : > { %v2713_v56 = vsel %vm2709_vm3, %v3712_v5, 0.0 }
 0x4ad   : > { %2722 = vadd.xlane.f32.xlu1 %v2713_v56 }
 0x4ae   : > { %v3597_v57 = vpop.f32.mrb[8].mxu0 }
 0x4af   : > { %2724 = vadd.xlane.f32.xlu0 %v2714_v35  ;;  %v2652_v36 = vpop.f32.mrb[9].mxu0  ;;  %v3713_v37 = vadd.f32 %v3597_v57, %v411_v62 }
 0x4b0   : > { %v3714_v7 = vadd.f32 %v2652_v36, %v401_v58  ;;  %v3598_v61 = vpop.f32.mrb[10].mxu0  ;;  %v3807_v58 = vld [vmem:[%s4605_s3] sm:$0xff]  }
 0x4b1   : > { %v2655_v46 = vpop.f32.mrb[11].mxu0  ;;  %v3715_v0 = vadd.f32 %v3598_v61, %v416_v42  ;;  %v2718_v43 = vsel %vm2709_vm3, %v3713_v37, 0.0  ;;  %3607 = vmatprep.mubr.msk.bf16.mxu1 %vm2862_vm4, %v3807_v58 }
 0x4b2   : > { %v3716_v38 = vadd.f32 %v2655_v46, %v406_v51  ;;  %v2716_v40 = vsel %vm2709_vm3, %v3714_v7, 0.0 }
 0x4b3   : > { %2726 = vadd.xlane.f32.xlu0 %v2715_v39  ;;  %2728 = vadd.xlane.f32.xlu1 %v2716_v40  ;;  %v2719_v44 = vsel %vm2709_vm3, %v3715_v0, 0.0 }
 0x4b4   : > { %v2717_v10 = vsel %vm2709_vm3, %v3716_v38, 0.0 }
 0x4b7   : > { %2732 = vadd.xlane.f32.xlu1 %v2718_v43  ;;  %2730 = vadd.xlane.f32.xlu0 %v2717_v10 }
 0x4bb   : > { %2734 = vadd.xlane.f32.xlu0 %v2719_v44 }
 0x538   : > { %v2721_v47 = vpop.xlane.xlu0 %2720 }
 0x539   : > { %v2736_v49 = vmul.f32 0.125, %v2721_v47 }
 0x53a   : > { %v2723_v50 = vpop.xlane.xlu1 %2722 }
 0x53b   : > { %v4471_v52 = vsub.f32 %v3710_v41, %v2736_v49  ;;  %v2737_v53 = vmul.f32 0.125, %v2723_v50 }
 0x53c   : > { %v2725_v54 = vpop.xlane.xlu0 %2724 }
 0x53d   : > { %v4473_v12 = vsub.f32 %v3712_v5, %v2737_v53  ;;  %v2738_v20 = vmul.f32 0.125, %v2725_v54  ;;  %v2752_v3 = vmul.f32 %v4471_v52, %v4471_v52  ;;  %v336_v5 = vld [vmem:[%s4606_s4 + $0xb0] sm:$0xff] }
 0x53f   : > { %v4477_v48 = vsub.f32 %v3709_v32, %v2738_v20  ;;  %v2760_v59 = vsel %vm2709_vm3, %v2752_v3, 0.0  ;;  %v2753_v18 = vmul.f32 %v4473_v12, %v4473_v12  ;;  %v334_v32 = vld [vmem:[%s4606_s4 + $0xa0] sm:$0xff] }
 0x540   : > { %v2727_v4 = vpop.xlane.xlu0 %2726  ;;  %2768 = vadd.xlane.f32.xlu1 %v2760_v59  ;;  %v2729_v23 = vpop.xlane.xlu1 %2728 }
 0x541   : > { %v2739_v60 = vmul.f32 0.125, %v2727_v4  ;;  %v2740_v63 = vmul.f32 0.125, %v2729_v23  ;;  %v2761_v2 = vsel %vm2709_vm3, %v2753_v18, 0.0  ;;  %v2754_v6 = vmul.f32 %v4477_v48, %v4477_v48 }
 0x542   : > { %2770 = vadd.xlane.f32.xlu0 %v2761_v2 }
 0x543   : > { %v4487_v55 = vsub.f32 %v3711_v34, %v2739_v60  ;;  %v4489_v8 = vsub.f32 %v3714_v7, %v2740_v63  ;;  %v2762_v9 = vsel %vm2709_vm3, %v2754_v6, 0.0 }
 0x544   : > { %2772 = vadd.xlane.f32.xlu1 %v2762_v9  ;;  %v2733_v11 = vpop.xlane.xlu1 %2732  ;;  %v2731_v13 = vpop.xlane.xlu0 %2730 }
 0x545   : > { %v2742_v16 = vmul.f32 0.125, %v2733_v11  ;;  %v2741_v1 = vmul.f32 0.125, %v2731_v13  ;;  %v2756_v14 = vmul.f32 %v4489_v8, %v4489_v8  ;;  %v2755_v17 = vmul.f32 %v4487_v55, %v4487_v55 }
 0x547   : > { %v4497_v19 = vsub.f32 %v3713_v37, %v2742_v16  ;;  %v4499_v21 = vsub.f32 %v3716_v38, %v2741_v1  ;;  %v2764_v22 = vsel %vm2709_vm3, %v2756_v14, 0.0  ;;  %v2763_v15 = vsel %vm2709_vm3, %v2755_v17, 0.0 }
 0x548   : > { %2776 = vadd.xlane.f32.xlu1 %v2764_v22  ;;  %2774 = vadd.xlane.f32.xlu0 %v2763_v15  ;;  %v2735_v24 = vpop.xlane.xlu0 %2734 }
 0x549   : > { %v2743_v25 = vmul.f32 0.125, %v2735_v24  ;;  %v2758_v27 = vmul.f32 %v4497_v19, %v4497_v19  ;;  %v2757_v28 = vmul.f32 %v4499_v21, %v4499_v21 }
 0x54b   : > { %v4509_v29 = vsub.f32 %v3715_v0, %v2743_v25  ;;  %v2766_v41 = vsel %vm2709_vm3, %v2758_v27, 0.0  ;;  %v2765_v30 = vsel %vm2709_vm3, %v2757_v28, 0.0 }
 0x54c   : > { %2780 = vadd.xlane.f32.xlu1 %v2766_v41  ;;  %2778 = vadd.xlane.f32.xlu0 %v2765_v30 }
 0x54d   : > { %v2759_v45 = vmul.f32 %v4509_v29, %v4509_v29 }
 0x54f   : > { %v2767_v31 = vsel %vm2709_vm3, %v2759_v45, 0.0 }
 0x550   : > { %2782 = vadd.xlane.f32.xlu0 %v2767_v31 }
 0x55d   : > { %2834 = vperm.xlu1 %3788, %v334_v32  }
 0x561   : > { %2844 = vperm.xlu1 %3788, %v336_v5  }
 0x565   : > { %2849 = vperm.xlu1 %3788, %v337_v33  }
 0x566   : > { %2839 = vperm.xlu0 %3787, %v335_v26  }
 0x5cd   : > { %v2769_v56 = vpop.xlane.xlu1 %2768 }
 0x5ce   : > { %v2784_v34 = vmul.f32 0.125, %v2769_v56 }
 0x5cf   : > { %v2771_v57 = vpop.xlane.xlu0 %2770 }
 0x5d0   : > { %v2792_v35 = vadd.f32 1e-05, %v2784_v34  ;;  %v2785_v51 = vmul.f32 0.125, %v2771_v57 }
 0x5d1   : > { %v2773_v36 = vpop.xlane.xlu1 %2772 }
 0x5d2   : > { %3841 = vrsqrt.f32 %v2792_v35  ;;  %v2793_v7 = vadd.f32 1e-05, %v2785_v51  ;;  %v2786_v61 = vmul.f32 0.125, %v2773_v36 }
 0x5d4   : > { %3843 = vrsqrt.f32 %v2793_v7  ;;  %v2794_v62 = vadd.f32 1e-05, %v2786_v61 }
 0x5d5   : > { %v2777_v46 = vpop.xlane.xlu1 %2776  ;;  %v2775_v37 = vpop.xlane.xlu0 %2774 }
 0x5d6   : > { %v2788_v38 = vmul.f32 0.125, %v2777_v46  ;;  %v2787_v39 = vmul.f32 0.125, %v2775_v37  ;;  %3845 = vrsqrt.f32 %v2794_v62 }
 0x5d8   : > { %v2796_v40 = vadd.f32 1e-05, %v2788_v38  ;;  %v2795_v42 = vadd.f32 1e-05, %v2787_v39 }
 0x5d9   : > { %v2781_v0 = vpop.xlane.xlu1 %2780  ;;  %v2779_v43 = vpop.xlane.xlu0 %2778 }
 0x5da   : > { %3847 = vrsqrt.f32 %v2796_v40  ;;  %v2790_v10 = vmul.f32 0.125, %v2781_v0  ;;  %v2789_v44 = vmul.f32 0.125, %v2779_v43 }
 0x5db   : > { %3849 = vrsqrt.f32 %v2795_v42 }
 0x5dc   : > { %v3842_v47 = vpop.eup %3841  ;;  %v2798_v49 = vadd.f32 1e-05, %v2790_v10  ;;  %v2797_v50 = vadd.f32 1e-05, %v2789_v44 }
 0x5dd   : > { %v2783_v53 = vpop.xlane.xlu0 %2782  ;;  %v2808_v54 = vmul.f32 %v3842_v47, %v4471_v52 }
 0x5de   : > { %v3844_v20 = vpop.eup %3843  ;;  %3851 = vrsqrt.f32 %v2798_v49  ;;  %v2791_v3 = vmul.f32 0.125, %v2783_v53 }
 0x5df   : > { %3853 = vrsqrt.f32 %v2797_v50  ;;  %v2809_v59 = vmul.f32 %v3844_v20, %v4473_v12  ;;  %v2816_v23 = vmax.f32 %v2808_v54, 0.0 }
 0x5e0   : > { %v2799_v18 = vadd.f32 1e-05, %v2791_v3  ;;  %v3846_v4 = vpop.eup %3845 }
 0x5e1   : > { %v2817_v60 = vmax.f32 %v2809_v59, 0.0  ;;  %v2810_v6 = vmul.f32 %v3846_v4, %v4477_v48 }
 0x5e2   : > { %3855 = vrsqrt.f32 %v2799_v18 }
 0x5e3   : > { %v2828_v63 = vpack.c.bf16 %v2817_v60, %v2816_v23  ;;  %v2818_v13 = vmax.f32 %v2810_v6, 0.0 }
 0x5e4   : > { %v3848_v2 = vpop.eup %3847 }
 0x5e5   : > { %v3850_v9 = vpop.eup %3849  ;;  %3599 = vmatprep.subr.bf16.mxu1 %v2828_v63  ;;  %v2812_v1 = vmul.f32 %v3848_v2, %v4489_v8  ;;  %v2840_v33 = vpop.permute.xlu0 %2839 }
 0x5e6   : > { %3600 = vmatpush3.bf16.msra.mxu1 %v2828_v63  ;;  %v2811_v52 = vmul.f32 %v3850_v9, %v4487_v55 }
 0x5e7   : > { %v2820_v48 = vmax.f32 %v2812_v1, 0.0 }
 0x5e8   : > { %v3852_v11 = vpop.eup %3851  ;;  %v2819_v16 = vmax.f32 %v2811_v52, 0.0 }
 0x5e9   : > { %v3854_v12 = vpop.eup %3853  ;;  %v2814_v22 = vmul.f32 %v3852_v11, %v4497_v19  ;;  %v3808_v19 = vld [vmem:[%s4605_s3 + $0x8] sm:$0xff]  }
 0x5ea   : > { %v2829_v14 = vpack.c.bf16 %v2819_v16, %v2818_v13  ;;  %v2813_v17 = vmul.f32 %v3854_v12, %v4499_v21  ;;  %v2835_v21 = vpop.permute.xlu1 %2834 }
 0x5eb   : > { %v2822_v27 = vmax.f32 %v2814_v22, 0.0 }
 0x5ec   : > { %v3856_v15 = vpop.eup %3855  ;;  %3601 = vmatprep.subr.bf16.mxu1 %v2829_v14  ;;  %v2821_v24 = vmax.f32 %v2813_v17, 0.0 }
 0x5ed   : > { %3602 = vmatpush3.bf16.msra.mxu1 %v2829_v14  ;;  %v2815_v25 = vmul.f32 %v3856_v15, %v4509_v29 }
 0x5ee   : > { %v2830_v55 = vpack.c.bf16 %v2821_v24, %v2820_v48  ;;  %v2845_v41 = vpop.permute.xlu1 %2844 }
 0x5ef   : > { %v2823_v28 = vmax.f32 %v2815_v25, 0.0 }
 0x5f0   : > { %3603 = vmatprep.subr.bf16.mxu1 %v2830_v55 }
 0x5f1   : > { %3604 = vmatpush3.bf16.msra.mxu1 %v2830_v55  ;;  %v2831_v8 = vpack.c.bf16 %v2823_v28, %v2822_v27 }
 0x5f2   : > { %v2850_v31 = vpop.permute.xlu1 %2849 }
 0x5f3   : > { %3605 = vmatprep.subr.bf16.mxu1 %v2831_v8 }
 0x5f5   : > { %3606 = vmatpush3.bf16.msra.mxu1 %v2831_v8 }
 0x5f8   : > { %3608 = vmatmul.mubr.msk.bf16.vlgmr.msra.gmra.mrb[48].mxu1 %vm2862_vm4, %v3808_v19 }
 0x6cb   : > { %v3609_v29 = vpop.f32.mrb[48].mxu1 }
 0x6cc   : > { %v2912_v30 = vadd.f32 %v3609_v29, %v2845_v41  ;;  %v2903_v45 = vpop.f32.mrb[49].mxu1 }
 0x6cd   : > { %v2904_v32 = vadd.f32 %v2903_v45, %v2835_v21  ;;  %v3610_v5 = vpop.f32.mrb[50].mxu1 }
 0x6ce   : > { %2920 = vst [vmem:[%s267_s7 + $0x10] sm:$0xff] %v2912_v30  ;;  %v2915_v26 = vadd.f32 %v3610_v5, %v2850_v31  ;;  %v2906_v58 = vpop.f32.mrb[51].mxu1 }
 0x6cf   : > { %2918 = vst [vmem:[%s267_s7] sm:$0xff] %v2904_v32  ;;  %v2907_v56 = vadd.f32 %v2906_v58, %v2840_v33 }
 0x6d0   : > { %2921 = vst [vmem:[%s267_s7 + $0x18] sm:$0xff] %v2915_v26 }
 0x6d1   : > { %2919 = vst [vmem:[%s267_s7 + $0x8] sm:$0xff] %v2907_v56 }
 0x6d2   : > { %3870 = shalt.err (!%p3867_p5)
}
 0x6d3   : > { %s3871_s24 = scalar_lea.hbm %s4554_s12, 512  ;;  %s3875_s27 = scalar_lea.hbm %s4607_s5, 1024 }
 0x6d4   : > { %p3872_p6 = scmp.ne.s32.totalorder %s4554_s12, %s3871_s24  ;;  %p3876_p10 = scmp.lt.u32.totalorder %s4554_s12, %s4607_s5 }
 0x6d5   : > { %p3877_p11 = scmp.lt.u32.totalorder %s3875_s27, %s3871_s24  ;;  %p3879_p13 = scmp.lt.u32.totalorder %s3871_s24, %s4554_s12 }
 0x6d6   : > { %p3873_p7 = pnand %p3872_p6, %p4015_p4 }
 0x6d7   : > { %p3878_p12 = por %p3877_p11, %p3876_p10 }
 0x6d8   : > { %p3874_p9 = pneg %p3873_p7 }
 0x6d9   : > { %p3880_p0 = por %p3879_p13, %p3878_p12 }
 0x6db   : > { %p3881_p1 = pnand %p3880_p0, %p3874_p9 }
 0x6dd   : > { %3884 = shalt.err (!%p3881_p1)
}
 0x6de   : > { %s3943_s9 = smov 128   ;;  %s3944_s10 = smov 8  }
 0x6df   : > { %3725 = dma.vmem_to_hbm [thread:$0]  (%p4015_p4), %s4549_s8, 512, %s4554_s12, %s4556_s21, %s3943_s9, %s3943_s9, %s3944_s10  }
 0x6e0 PF: > { %p3731_p2 = scmp.ge.s32.totalorder %s3935_s23, 2  ;;  %s2951_s11 = sand.u32 1, %s3915_s18  }
 0x6e1   : > { %s2952_s13 = scalar_lea.sflag [#allocation8], %s2951_s11 }
 0x6e2   : > { %p3728_p3 = pnand %p3731_p2, %p4022_p8 }
 0x6e4   : > { %3910 = dma.done.wait (!%p3728_p3), %s2952_s13, 512  }
 0x6e5   : > { %3912 = vsyncadd (!%p3728_p3), %s2952_s13, 4294966784  ;;  %s18_s23 = sadd.s32 1, %s3935_s23   ;;  %s4610_s18 = smov %s3919_s19 }
 0x6e6   : > { %p15_p5 = scmp.ge.s32.totalorder %s18_s23, 4   ;;  %s4611_s19 = smov %s3923_s20 }
 0x6e7   : > { %s4612_s20 = smov %s4028_s6  ;;  %s4613_s21 = smov %s3931_s22 }
 0x6e8   : > { %s4614_s22 = smov %s4616_s26  ;;  %17 = sbr.rel (!%p15_p5) target bundleno = 4 (0x4), region = 92 }
 0x6ef   :  { %2957 = vsyncpa [#allocation8], 1 }
 0x6f0   :  { %2959 = vsyncpa [#allocation8 + $0x1], 1 }

</bundles_post_ra>
